<compile_context>
chip_gen: v5e
topology: v5e:2x2
jax: 0.10.0
libtpu: 0.0.40
codegen_flags: <defaults>
</compile_context>

<pallas_src>
import functools
import math

import jax
import jax.numpy as jnp
from jax.experimental import pallas as pl
from jax.experimental.pallas import tpu as pltpu


# ----------------------------------------------------------------------------
# VMEM budget helpers
# ----------------------------------------------------------------------------
def _vmem_budget():
    cap = 64 << 20                         # v7x physical (smallest across gens)
    try:
        cap = int(pltpu.get_tpu_info().vmem_capacity_bytes)
    except Exception:
        pass
    # (per-step working-set budget for the tile picker, scoped vmem limit)
    return int(cap * 0.40), int(cap * 0.70)


def _divisors(n):
    return [d for d in range(1, n + 1) if n % d == 0]


# ----------------------------------------------------------------------------
# Kernel A: primary conv + cheap op + concat, fused with the gating multiply.
# Grid = (B, H // TH); 1-row halos via two single-row inputs whose index maps
# clamp at the border and are zeroed in-kernel (valid because the conv is
# bias-free and ReLU(0)=0, so a zero row == zero padding).
# ----------------------------------------------------------------------------
def _main_gated_kernel(x_ref, xt_ref, xb_ref, g_ref, w_ref, wc_ref, o_ref, *,
                       init_ch, shared, mxu_bf16):
    TH, W, Cin = x_ref.shape[1], x_ref.shape[2], x_ref.shape[3]
    c_tot = w_ref.shape[1]
    new_ch = wc_ref.shape[2]
    oup = o_ref.shape[3]
    keep2 = oup - init_ch
    THp = TH // 2
    f32 = jnp.float32

    h = pl.program_id(1)
    top_ok = (h > 0).astype(f32)
    bot_ok = (h < pl.num_programs(1) - 1).astype(f32)

    # One slab of rows: [top halo | TH tile rows | bottom halo].
    xt = xt_ref[0].astype(f32) * top_ok                     # (1, W, Cin)
    xb = xb_ref[0].astype(f32) * bot_ok
    xs = jnp.concatenate([xt, x_ref[0].astype(f32), xb], axis=0)   # (TH+2, W, Cin)

    # Single fused primary-conv matmul over all TH+2 rows (M = (TH+2)*W).
    a = xs.reshape((TH + 2) * W, Cin)
    w = w_ref[...]
    if mxu_bf16:
        a = a.astype(jnp.bfloat16)
        w = w.astype(jnp.bfloat16)
    y = jnp.maximum(jnp.dot(a, w, preferred_element_type=f32), 0.0)
    y = y.reshape(TH + 2, W, c_tot)

    if shared:                       # ratio == 2: cheap-op input == x1 (identity groups)
        x1 = y[1:TH + 1]             # (TH,   W, init_ch)
        x1e = y                      # (TH+2, W, new_ch) incl. halo rows
    else:
        x1 = y[1:TH + 1, :, :init_ch]
        x1e = y[:, :, init_ch:]

    # cheap_operation: depthwise 3x3 + ReLU.  W taps via XLU rolls, boundary
    # masks hoisted out of the tap loop; H taps via the halo rows.
    wi = jax.lax.broadcasted_iota(jnp.int32, x1e.shape, 1)
    xm1 = jnp.where(wi >= 1, pltpu.roll(x1e, 1, axis=1), 0.0)          # from w-1
    xp1 = jnp.where(wi < W - 1, pltpu.roll(x1e, W - 1, axis=1), 0.0)   # from w+1
    shifted = (xm1, x1e, xp1)

    wc = wc_ref[...]                                                    # (3,3,new_ch)
    acc = jnp.zeros((TH, W, new_ch), f32)
    for kh in range(3):
        for kw in range(3):
            acc = acc + shifted[kw][kh:kh + TH] * wc[kh, kw][None, None, :]
    x2 = jnp.maximum(acc, 0.0)

    out = x1 if keep2 == 0 else jnp.concatenate([x1, x2[:, :, :keep2]], axis=-1)

    # Gating: the gate arrives already W-upsampled; pair output rows for the
    # nearest x2 along H (free leading-dim reshape, broadcast on an untiled dim).
    g = g_ref[0]                                                        # (THp, W, oup)
    yg = out.reshape(THp, 2, W, oup) * g[:, None, :, :]
    o_ref[0] = yg.reshape(TH, W, oup).astype(o_ref.dtype)


def _pick_h_tile_a(H, W, Cin, oup, c_tot, new_ch, budget):
    def nbytes(t):
        io2 = 2 * (t * W * Cin + 2 * W * Cin + (t // 2) * W * oup + t * W * oup)
        live = (t + 2) * W * (c_tot + 3 * new_ch) + t * W * (new_ch + 2 * oup)
        return 4 * (io2 + live)
    cands = [d for d in _divisors(H) if d % 2 == 0]
    fit = [d for d in cands if nbytes(d) <= budget]
    return max(fit) if fit else min(cands)


def main_branch_gated(x, gate_w, w_all, w_cheap, *, init_ch, oup, shared,
                      h_tile=None, mxu_bf16=False):
    """x: (B,H,W,Cin); gate_w: (B,H//2,W,oup) -> gated output (B,H,W,oup)."""
    B, H, W, Cin = x.shape
    c_tot = w_all.shape[1]
    new_ch = w_cheap.shape[2]
    budget, vmem_limit = _vmem_budget()
    if h_tile is None:
        h_tile = _pick_h_tile_a(H, W, Cin, oup, c_tot, new_ch, budget)
    TH = h_tile
    assert H % TH == 0 and TH % 2 == 0, (H, TH)
    nH = H // TH
    THp = TH // 2

    kernel = functools.partial(_main_gated_kernel, init_ch=init_ch,
                               shared=shared, mxu_bf16=mxu_bf16)
    return pl.pallas_call(
        kernel,
        out_shape=jax.ShapeDtypeStruct((B, H, W, oup), x.dtype),
        grid=(B, nH),
        in_specs=[
            pl.BlockSpec((1, TH, W, Cin), lambda b, h: (b, h, 0, 0)),
            pl.BlockSpec((1, 1, W, Cin),
                         lambda b, h: (b, jnp.maximum(h * TH - 1, 0), 0, 0)),
            pl.BlockSpec((1, 1, W, Cin),
                         lambda b, h: (b, jnp.minimum(h * TH + TH, H - 1), 0, 0)),
            pl.BlockSpec((1, THp, W, oup), lambda b, h: (b, h, 0, 0)),
            pl.BlockSpec((Cin, c_tot), lambda b, h: (0, 0)),
            pl.BlockSpec((3, 3, new_ch), lambda b, h: (0, 0, 0)),
        ],
        out_specs=pl.BlockSpec((1, TH, W, oup), lambda b, h: (b, h, 0, 0)),
        compiler_params=pltpu.CompilerParams(
            dimension_semantics=("parallel", "parallel"),
            vmem_limit_bytes=vmem_limit),
    )(x, x, x, gate_w, w_all, w_cheap)


# ----------------------------------------------------------------------------
# Kernel B: attention branch: avg_pool(1,2,2) + 1x1 conv + dw 1x5 (W) +
# dw 5x1 (H) + sigmoid.  H-tiled over pooled rows with +/-2 pooled-row halos
# (four single-pooled-row inputs, border rows zeroed in-kernel).  The gate is
# stored W-duplicated along lanes so the x2 W-upsample is a free wrapper
# reshape and the full-resolution gate never hits HBM.
# ----------------------------------------------------------------------------
def _attn_gate_kernel(x_ref, t2_ref, t1_ref, b1_ref, b2_ref,
                      w1_ref, ww_ref, wh_ref, o_ref, *, mxu_bf16):
    THB = o_ref.shape[1]
    Wp = x_ref.shape[2]
    C2 = x_ref.shape[3]
    oup = ww_ref.shape[1]
    f32 = jnp.float32

    h = pl.program_id(1)
    top_ok = (h > 0).astype(f32)
    bot_ok = (h < pl.num_programs(1) - 1).astype(f32)

    # avg_pool(1,2,2): H half of the pool on the VPU (row pairs); the W half is
    # folded into the 1x1-conv matmul via the stacked 0.5*[W1; W1] weight.
    v = x_ref[0].astype(f32).reshape(THB, 2, Wp, C2)
    vp_main = (v[:, 0] + v[:, 1]) * 0.5                       # (THB, Wp, C2)

    def pool_halo(r_ref, ok):
        r = r_ref[0].astype(f32)                              # (2, Wp, C2)
        return ((r[0] + r[1]) * (0.5 * ok))[None]             # (1, Wp, C2)

    vp = jnp.concatenate(
        [pool_halo(t2_ref, top_ok), pool_halo(t1_ref, top_ok),
         vp_main,
         pool_halo(b1_ref, bot_ok), pool_halo(b2_ref, bot_ok)],
        axis=0)                                               # (THB+4, Wp, C2)

    # 1x1 conv (+ W pool): ONE matmul with M = (THB+4)*Wp.
    a = vp.reshape((THB + 4) * Wp, C2)
    w1 = w1_ref[...]
    if mxu_bf16:
        a = a.astype(jnp.bfloat16)
        w1 = w1.astype(jnp.bfloat16)
    s = jnp.dot(a, w1, preferred_element_type=f32).reshape(THB + 4, Wp, oup)

    # depthwise 1x5 along W: XLU rolls, iota built once (masks hoisted).
    ww = ww_ref[...]
    wi = jax.lax.broadcasted_iota(jnp.int32, s.shape, 1)
    t = s * ww[2][None, None, :]
    for k, dw in ((0, -2), (1, -1), (3, 1), (4, 2)):
        r = pltpu.roll(s, (-dw) % Wp, axis=1)
        m = (wi >= -dw) if dw < 0 else (wi < Wp - dw)
        t = t + jnp.where(m, r, 0.0) * ww[k][None, None, :]

    # depthwise 5x1 along H: the halo rows supply the neighbours, borders are
    # zero (zeroed pooled input -> zero s -> zero t, bias-free convs).
    wh = wh_ref[...]
    r = t[0:THB] * wh[0][None, None, :]
    for k in range(1, 5):
        r = r + t[k:k + THB] * wh[k][None, None, :]

    g = jax.nn.sigmoid(r)
    # W-duplicate along lanes -> (THB, Wp, 2*oup); the wrapper reshape turns it
    # into the nearest x2 upsample along W for free.
    o_ref[0] = jnp.concatenate([g, g], axis=-1).astype(o_ref.dtype)


def _pick_h_tile_b(Hp, Wp, C2, oup, budget):
    def nbytes(t):
        io2 = 2 * ((2 * t + 8) * Wp * C2 + t * Wp * 2 * oup)
        live = (t + 4) * Wp * (C2 + 3 * oup) + t * Wp * 3 * oup
        return 4 * (io2 + live)
    if Hp == 1:
        return 1
    cands = [d for d in _divisors(Hp) if d >= 2]
    fit = [d for d in cands if nbytes(d) <= budget]
    return max(fit) if fit else min(cands)


def attention_gate(x_packed, w1_stacked, w_short_w, w_short_h, *,
                   hb_tile=None, mxu_bf16=False):
    """x_packed: (B,H,W//2,2*Cin) -> W-duplicated gate (B,H//2,W//2,2*oup)."""
    B, H, Wp, C2 = x_packed.shape
    oup = w_short_w.shape[1]
    Hp = H // 2
    budget, vmem_limit = _vmem_budget()
    if hb_tile is None:
        hb_tile = _pick_h_tile_b(Hp, Wp, C2, oup, budget)
    THB = hb_tile
    assert Hp % THB == 0 and (THB >= 2 or THB == Hp), (Hp, THB)
    nH = Hp // THB

    kernel = functools.partial(_attn_gate_kernel, mxu_bf16=mxu_bf16)
    return pl.pallas_call(
        kernel,
        out_shape=jax.ShapeDtypeStruct((B, Hp, Wp, 2 * oup), x_packed.dtype),
        grid=(B, nH),
        in_specs=[
            pl.BlockSpec((1, 2 * THB, Wp, C2), lambda b, h: (b, h, 0, 0)),
            pl.BlockSpec((1, 2, Wp, C2),
                         lambda b, h: (b, jnp.maximum(h * THB - 2, 0), 0, 0)),
            pl.BlockSpec((1, 2, Wp, C2),
                         lambda b, h: (b, jnp.maximum(h * THB - 1, 0), 0, 0)),
            pl.BlockSpec((1, 2, Wp, C2),
                         lambda b, h: (b, jnp.minimum((h + 1) * THB, Hp - 1), 0, 0)),
            pl.BlockSpec((1, 2, Wp, C2),
                         lambda b, h: (b, jnp.minimum((h + 1) * THB + 1, Hp - 1), 0, 0)),
            pl.BlockSpec((C2, oup), lambda b, h: (0, 0)),
            pl.BlockSpec((5, oup), lambda b, h: (0, 0)),
            pl.BlockSpec((5, oup), lambda b, h: (0, 0)),
        ],
        out_specs=pl.BlockSpec((1, THB, Wp, 2 * oup), lambda b, h: (b, h, 0, 0)),
        compiler_params=pltpu.CompilerParams(
            dimension_semantics=("parallel", "parallel"),
            vmem_limit_bytes=vmem_limit),
    )(x_packed, x_packed, x_packed, x_packed, x_packed,
      w1_stacked, w_short_w, w_short_h)


# ----------------------------------------------------------------------------
# Parameter init (deterministic; torch Conv3d weights stored transposed).
# ----------------------------------------------------------------------------
def init_params(key, inp, oup, ratio=2, dw_size=3):
    init_ch = math.ceil(oup / ratio)
    new_ch = init_ch * (ratio - 1)
    k = jax.random.split(key, 5)
    return {
        # torch (init_ch, inp, 1,1,1) -> (inp, init_ch)
        "w_primary": 0.1 * jax.random.normal(k[0], (inp, init_ch), jnp.float32),
        # torch (new_ch, 1, 1, 3, 3) -> (3, 3, new_ch)
        "w_cheap": 0.1 * jax.random.normal(k[1], (dw_size, dw_size, new_ch),
                                           jnp.float32),
        # short_conv[0]: torch (oup, inp, 1,1,1) -> (inp, oup)
        "w_short1": 0.1 * jax.random.normal(k[2], (inp, oup), jnp.float32),
        # short_conv[1]: torch (oup, 1, 1, 1, 5) -> (5, oup)  (along W)
        "w_short_w": 0.1 * jax.random.normal(k[3], (5, oup), jnp.float32),
        # short_conv[2]: torch (oup, 1, 1, 5, 1) -> (5, oup)  (along H)
        "w_short_h": 0.1 * jax.random.normal(k[4], (5, oup), jnp.float32),
    }


# ----------------------------------------------------------------------------
# GhostModuleV2 forward, mode='attn'.
# ----------------------------------------------------------------------------
def ghost_module_v2_attn(x_ncdhw, params, *, oup, ratio=2, h_tile=None,
                         hb_tile=None, mxu_bf16=False):
    N, Cin, D, H, W = x_ncdhw.shape
    assert H % 2 == 0 and W % 2 == 0, (H, W)
    assert W % 16 == 0, W       # keeps in-kernel row-collapse reshapes aligned
    init_ch = math.ceil(oup / ratio)
    new_ch = init_ch * (ratio - 1)
    B = N * D

    # NCDHW -> channels-last (B = N*D, H, W, Cin)
    x = jnp.transpose(x_ncdhw, (0, 2, 3, 4, 1)).reshape(B, H, W, Cin)

    # --- attention branch (kernel B) ---
    # free row-major view packing W pairs into lanes: [..,2j+k,c] -> [..,j,k*Cin+c]
    x_packed = x.reshape(B, H, W // 2, 2 * Cin)
    w1_stacked = 0.5 * jnp.concatenate([params["w_short1"],
                                        params["w_short1"]], axis=0)
    gate = attention_gate(x_packed, w1_stacked, params["w_short_w"],
                          params["w_short_h"], hb_tile=hb_tile,
                          mxu_bf16=mxu_bf16)
    # (B, H/2, W/2, 2*oup) -> (B, H/2, W, oup): free reshape == nearest x2 on W
    gate = gate.reshape(B, H // 2, W, oup)

    # --- main branch fused with gating (kernel A) ---
    if ratio == 2:
        assert new_ch == init_ch
        w_all = params["w_primary"]          # cheap-op input == x1 (identity groups)
        shared = True
    else:
        grp = jnp.arange(new_ch) // (ratio - 1)
        # fold the grouped-conv channel replication into the fused weight
        w_all = jnp.concatenate([params["w_primary"],
                                 params["w_primary"][:, grp]], axis=1)
        shared = False

    y = main_branch_gated(x, gate, w_all, params["w_cheap"], init_ch=init_ch,
                          oup=oup, shared=shared, h_tile=h_tile,
                          mxu_bf16=mxu_bf16)
    # (B, H, W, oup) -> NCDHW
    return jnp.transpose(y.reshape(N, D, H, W, oup), (0, 4, 1, 2, 3))


# ----------------------------------------------------------------------------
# Plain-JAX reference of the same forward pass (numerical cross-check).
# ----------------------------------------------------------------------------
def _reference_bhwc(x, params, *, oup, ratio=2):
    B, H, W, Cin = x.shape
    init_ch = math.ceil(oup / ratio)
    new_ch = init_ch * (ratio - 1)
    hi = jax.lax.Precision.HIGHEST

    x1 = jax.nn.relu(jnp.einsum("bhwc,cd->bhwd", x, params["w_primary"],
                                precision=hi))
    grp = jnp.arange(new_ch) // (ratio - 1)
    x1e = x1[..., grp]
    xp = jnp.pad(x1e, ((0, 0), (1, 1), (1, 1), (0, 0)))
    x2 = jnp.zeros((B, H, W, new_ch), jnp.float32)
    for kh in range(3):
        for kw in range(3):
            x2 = x2 + xp[:, kh:kh + H, kw:kw + W, :] * params["w_cheap"][kh, kw]
    x2 = jax.nn.relu(x2)
    out = jnp.concatenate([x1, x2], axis=-1)[..., :oup]

    Hp, Wp = H // 2, W // 2
    pooled = x.reshape(B, Hp, 2, Wp, 2, Cin).mean(axis=(2, 4))
    s = jnp.einsum("bhwc,cd->bhwd", pooled, params["w_short1"], precision=hi)
    sp = jnp.pad(s, ((0, 0), (0, 0), (2, 2), (0, 0)))
    t = jnp.zeros((B, Hp, Wp, oup), jnp.float32)
    for k in range(5):
        t = t + sp[:, :, k:k + Wp, :] * params["w_short_w"][k]
    tp = jnp.pad(t, ((0, 0), (2, 2), (0, 0), (0, 0)))
    r = jnp.zeros((B, Hp, Wp, oup), jnp.float32)
    for k in range(5):
        r = r + tp[:, k:k + Hp, :, :] * params["w_short_h"][k]
    gate = jax.nn.sigmoid(r)
    gate_up = jnp.repeat(jnp.repeat(gate, 2, axis=1), 2, axis=2)
    return out * gate_up


if __name__ == "__main__":
    key = jax.random.PRNGKey(0)
    kx, kp = jax.random.split(key)

    N, Cin, D, H, W = 2, 4, 2, 16, 16
    oup = 8

    x = jax.random.normal(kx, (N, Cin, D, H, W), jnp.float32)
    params = init_params(kp, Cin, oup)

    xb = jnp.transpose(x, (0, 2, 3, 4, 1)).reshape(N * D, H, W, Cin)
    ref = _reference_bhwc(xb, params, oup=oup)
    ref = jnp.transpose(ref.reshape(N, D, H, W, oup), (0, 4, 1, 2, 3))

    # 1) auto (VMEM-budget) tile sizes -- whole image per grid step at this size
    y = jax.block_until_ready(ghost_module_v2_attn(x, params, oup=oup))
    assert y.shape == (N, oup, D, H, W), y.shape
    assert bool(jnp.all(jnp.isfinite(y)))
    err = float(jnp.max(jnp.abs(y - ref)))
    assert err < 1e-3, err

    # 2) forced small tiles: exercises the halo paths of both kernels
    y2 = jax.block_until_ready(
        ghost_module_v2_attn(x, params, oup=oup, h_tile=8, hb_tile=4))
    err2 = float(jnp.max(jnp.abs(y2 - ref)))
    assert err2 < 1e-3, err2

    # 3) bf16 MXU operands (v6e / v7x lever); taps, masks and sigmoid stay f32
    y3 = jax.block_until_ready(
        ghost_module_v2_attn(x, params, oup=oup, h_tile=8, hb_tile=4,
                             mxu_bf16=True))
    err3 = float(jnp.max(jnp.abs(y3 - ref)))
    assert err3 < 5e-2, err3

    print("KERNEL_OK")
</pallas_src>

<mosaic_0001>
module attributes {stable_mosaic.version = 11 : i64} {
  func.func @_attn_gate_kernel(%arg0: i32, %arg1: i32, %arg2: memref<1x16x8x8xf32, #tpu.memory_space<vmem>>, %arg3: memref<1x2x8x8xf32, #tpu.memory_space<vmem>>, %arg4: memref<1x2x8x8xf32, #tpu.memory_space<vmem>>, %arg5: memref<1x2x8x8xf32, #tpu.memory_space<vmem>>, %arg6: memref<1x2x8x8xf32, #tpu.memory_space<vmem>>, %arg7: memref<8x8xf32, #tpu.memory_space<vmem>>, %arg8: memref<5x8xf32, #tpu.memory_space<vmem>>, %arg9: memref<5x8xf32, #tpu.memory_space<vmem>>, %arg10: memref<1x8x8x16xf32, #tpu.memory_space<vmem>>) attributes {dimension_semantics = [#tpu.dimension_semantics<parallel>, #tpu.dimension_semantics<parallel>], iteration_bounds = array<i64: 4, 1>, scalar_prefetch = 0 : i64, scratch_operands = 0 : i64, tpu.core_type = #tpu.core_type<tc>, window_params = [{transform_indices = @transform_0, window_bounds = array<i64: 1, 16, 8, 8>}, {transform_indices = @transform_1, window_bounds = array<i64: 1, 2, 8, 8>}, {transform_indices = @transform_2, window_bounds = array<i64: 1, 2, 8, 8>}, {transform_indices = @transform_3, window_bounds = array<i64: 1, 2, 8, 8>}, {transform_indices = @transform_4, window_bounds = array<i64: 1, 2, 8, 8>}, {pipeline_mode = #tpu.pipeline_mode<synchronous>, transform_indices = @transform_5, window_bounds = array<i64: 8, 8>}, {pipeline_mode = #tpu.pipeline_mode<synchronous>, transform_indices = @transform_6, window_bounds = array<i64: 5, 8>}, {pipeline_mode = #tpu.pipeline_mode<synchronous>, transform_indices = @transform_7, window_bounds = array<i64: 5, 8>}, {transform_indices = @transform_8, window_bounds = array<i64: 1, 8, 8, 16>}]} {
    %c0_i32 = arith.constant 0 : i32
    %0 = arith.cmpi sgt, %arg1, %c0_i32 : i32
    %1 = arith.extui %0 : i1 to i32
    %2 = arith.sitofp %1 : i32 to f32
    %c0_i32_0 = arith.constant 0 : i32
    %3 = arith.cmpi slt, %arg1, %c0_i32_0 : i32
    %4 = arith.extui %3 : i1 to i32
    %5 = arith.sitofp %4 : i32 to f32
    %c0 = arith.constant 0 : index
    %c0_1 = arith.constant 0 : index
    %c0_2 = arith.constant 0 : index
    %c0_3 = arith.constant 0 : index
    %6 = vector.load %arg2[%c0, %c0_1, %c0_2, %c0_3] : memref<1x16x8x8xf32, #tpu.memory_space<vmem>>, vector<1x16x8x8xf32>
    %7 = vector.shape_cast %6 : vector<1x16x8x8xf32> to vector<16x8x8xf32>
    %8 = vector.shape_cast %7 : vector<16x8x8xf32> to vector<8x2x8x8xf32>
    %9 = vector.extract_strided_slice %8 {offsets = [0, 0, 0, 0], sizes = [8, 1, 8, 8], strides = [1, 1, 1, 1]} : vector<8x2x8x8xf32> to vector<8x1x8x8xf32>
    %10 = vector.shape_cast %9 : vector<8x1x8x8xf32> to vector<8x8x8xf32>
    %11 = vector.extract_strided_slice %8 {offsets = [0, 1, 0, 0], sizes = [8, 1, 8, 8], strides = [1, 1, 1, 1]} : vector<8x2x8x8xf32> to vector<8x1x8x8xf32>
    %12 = vector.shape_cast %11 : vector<8x1x8x8xf32> to vector<8x8x8xf32>
    %13 = arith.addf %10, %12 : vector<8x8x8xf32>
    %cst = arith.constant 5.000000e-01 : f32
    %14 = vector.broadcast %cst : f32 to vector<8x8x8xf32>
    %15 = arith.mulf %13, %14 : vector<8x8x8xf32>
    %c0_4 = arith.constant 0 : index
    %c0_5 = arith.constant 0 : index
    %c0_6 = arith.constant 0 : index
    %c0_7 = arith.constant 0 : index
    %16 = vector.load %arg3[%c0_4, %c0_5, %c0_6, %c0_7] : memref<1x2x8x8xf32, #tpu.memory_space<vmem>>, vector<1x2x8x8xf32>
    %17 = vector.shape_cast %16 : vector<1x2x8x8xf32> to vector<2x8x8xf32>
    %18 = vector.extract_strided_slice %17 {offsets = [0, 0, 0], sizes = [1, 8, 8], strides = [1, 1, 1]} : vector<2x8x8xf32> to vector<1x8x8xf32>
    %19 = vector.shape_cast %18 : vector<1x8x8xf32> to vector<8x8xf32>
    %20 = vector.extract_strided_slice %17 {offsets = [1, 0, 0], sizes = [1, 8, 8], strides = [1, 1, 1]} : vector<2x8x8xf32> to vector<1x8x8xf32>
    %21 = vector.shape_cast %20 : vector<1x8x8xf32> to vector<8x8xf32>
    %22 = arith.addf %19, %21 : vector<8x8xf32>
    %cst_8 = arith.constant 5.000000e-01 : f32
    %23 = arith.mulf %cst_8, %2 : f32
    %24 = vector.broadcast %23 : f32 to vector<8x8xf32>
    %25 = arith.mulf %22, %24 : vector<8x8xf32>
    %26 = vector.shape_cast %25 : vector<8x8xf32> to vector<1x8x8xf32>
    %c0_9 = arith.constant 0 : index
    %c0_10 = arith.constant 0 : index
    %c0_11 = arith.constant 0 : index
    %c0_12 = arith.constant 0 : index
    %27 = vector.load %arg4[%c0_9, %c0_10, %c0_11, %c0_12] : memref<1x2x8x8xf32, #tpu.memory_space<vmem>>, vector<1x2x8x8xf32>
    %28 = vector.shape_cast %27 : vector<1x2x8x8xf32> to vector<2x8x8xf32>
    %29 = vector.extract_strided_slice %28 {offsets = [0, 0, 0], sizes = [1, 8, 8], strides = [1, 1, 1]} : vector<2x8x8xf32> to vector<1x8x8xf32>
    %30 = vector.shape_cast %29 : vector<1x8x8xf32> to vector<8x8xf32>
    %31 = vector.extract_strided_slice %28 {offsets = [1, 0, 0], sizes = [1, 8, 8], strides = [1, 1, 1]} : vector<2x8x8xf32> to vector<1x8x8xf32>
    %32 = vector.shape_cast %31 : vector<1x8x8xf32> to vector<8x8xf32>
    %33 = arith.addf %30, %32 : vector<8x8xf32>
    %cst_13 = arith.constant 5.000000e-01 : f32
    %34 = arith.mulf %cst_13, %2 : f32
    %35 = vector.broadcast %34 : f32 to vector<8x8xf32>
    %36 = arith.mulf %33, %35 : vector<8x8xf32>
    %37 = vector.shape_cast %36 : vector<8x8xf32> to vector<1x8x8xf32>
    %c0_14 = arith.constant 0 : index
    %c0_15 = arith.constant 0 : index
    %c0_16 = arith.constant 0 : index
    %c0_17 = arith.constant 0 : index
    %38 = vector.load %arg5[%c0_14, %c0_15, %c0_16, %c0_17] : memref<1x2x8x8xf32, #tpu.memory_space<vmem>>, vector<1x2x8x8xf32>
    %39 = vector.shape_cast %38 : vector<1x2x8x8xf32> to vector<2x8x8xf32>
    %40 = vector.extract_strided_slice %39 {offsets = [0, 0, 0], sizes = [1, 8, 8], strides = [1, 1, 1]} : vector<2x8x8xf32> to vector<1x8x8xf32>
    %41 = vector.shape_cast %40 : vector<1x8x8xf32> to vector<8x8xf32>
    %42 = vector.extract_strided_slice %39 {offsets = [1, 0, 0], sizes = [1, 8, 8], strides = [1, 1, 1]} : vector<2x8x8xf32> to vector<1x8x8xf32>
    %43 = vector.shape_cast %42 : vector<1x8x8xf32> to vector<8x8xf32>
    %44 = arith.addf %41, %43 : vector<8x8xf32>
    %cst_18 = arith.constant 5.000000e-01 : f32
    %45 = arith.mulf %cst_18, %5 : f32
    %46 = vector.broadcast %45 : f32 to vector<8x8xf32>
    %47 = arith.mulf %44, %46 : vector<8x8xf32>
    %48 = vector.shape_cast %47 : vector<8x8xf32> to vector<1x8x8xf32>
    %c0_19 = arith.constant 0 : index
    %c0_20 = arith.constant 0 : index
    %c0_21 = arith.constant 0 : index
    %c0_22 = arith.constant 0 : index
    %49 = vector.load %arg6[%c0_19, %c0_20, %c0_21, %c0_22] : memref<1x2x8x8xf32, #tpu.memory_space<vmem>>, vector<1x2x8x8xf32>
    %50 = vector.shape_cast %49 : vector<1x2x8x8xf32> to vector<2x8x8xf32>
    %51 = vector.extract_strided_slice %50 {offsets = [0, 0, 0], sizes = [1, 8, 8], strides = [1, 1, 1]} : vector<2x8x8xf32> to vector<1x8x8xf32>
    %52 = vector.shape_cast %51 : vector<1x8x8xf32> to vector<8x8xf32>
    %53 = vector.extract_strided_slice %50 {offsets = [1, 0, 0], sizes = [1, 8, 8], strides = [1, 1, 1]} : vector<2x8x8xf32> to vector<1x8x8xf32>
    %54 = vector.shape_cast %53 : vector<1x8x8xf32> to vector<8x8xf32>
    %55 = arith.addf %52, %54 : vector<8x8xf32>
    %cst_23 = arith.constant 5.000000e-01 : f32
    %56 = arith.mulf %cst_23, %5 : f32
    %57 = vector.broadcast %56 : f32 to vector<8x8xf32>
    %58 = arith.mulf %55, %57 : vector<8x8xf32>
    %59 = vector.shape_cast %58 : vector<8x8xf32> to vector<1x8x8xf32>
    %60 = tpu.concatenate %26, %37, %15, %48, %59 in 0 : vector<1x8x8xf32>, vector<1x8x8xf32>, vector<8x8x8xf32>, vector<1x8x8xf32>, vector<1x8x8xf32> -> vector<12x8x8xf32>
    %61 = vector.shape_cast %60 : vector<12x8x8xf32> to vector<96x8xf32>
    %c0_24 = arith.constant 0 : index
    %c0_25 = arith.constant 0 : index
    %62 = vector.load %arg7[%c0_24, %c0_25] : memref<8x8xf32, #tpu.memory_space<vmem>>, vector<8x8xf32>
    %cst_26 = arith.constant dense<0.000000e+00> : vector<96x8xf32>
    %63 = tpu.matmul %61, %62, %cst_26 {dimension_numbers = #tpu.dot_dimension_numbers<[1], [0], [0], [1], [0, 0, 1, 1], [], []>} : vector<96x8xf32>, vector<8x8xf32>, vector<96x8xf32> -> vector<96x8xf32>
    %64 = vector.shape_cast %63 : vector<96x8xf32> to vector<12x8x8xf32>
    %c0_27 = arith.constant 0 : index
    %c0_28 = arith.constant 0 : index
    %65 = vector.load %arg8[%c0_27, %c0_28] : memref<5x8xf32, #tpu.memory_space<vmem>>, vector<5x8xf32>
    %66 = tpu.iota {dimensions = array<i32: 1>} : vector<12x8x8xi32>
    %67 = vector.extract_strided_slice %65 {offsets = [2, 0], sizes = [1, 8], strides = [1, 1]} : vector<5x8xf32> to vector<1x8xf32>
    %68 = vector.shape_cast %67 : vector<1x8xf32> to vector<8xf32>
    %69 = vector.shape_cast %68 : vector<8xf32> to vector<1x1x8xf32>
    %70 = vector.broadcast %69 : vector<1x1x8xf32> to vector<12x8x8xf32>
    %71 = arith.mulf %64, %70 : vector<12x8x8xf32>
    %c2_i32 = arith.constant 2 : i32
    %72 = tpu.dynamic_rotate %64 by %c2_i32 dim 1 : vector<12x8x8xf32>, i32 -> vector<12x8x8xf32>
    %c2_i32_29 = arith.constant 2 : i32
    %73 = vector.broadcast %c2_i32_29 : i32 to vector<12x8x8xi32>
    %74 = arith.cmpi sge, %66, %73 : vector<12x8x8xi32>
    %cst_30 = arith.constant 0.000000e+00 : f32
    %75 = vector.broadcast %cst_30 : f32 to vector<12x8x8xf32>
    %76 = arith.select %74, %72, %75 : vector<12x8x8xi1>, vector<12x8x8xf32>
    %77 = vector.extract_strided_slice %65 {offsets = [0, 0], sizes = [1, 8], strides = [1, 1]} : vector<5x8xf32> to vector<1x8xf32>
    %78 = vector.shape_cast %77 : vector<1x8xf32> to vector<8xf32>
    %79 = vector.shape_cast %78 : vector<8xf32> to vector<1x1x8xf32>
    %80 = vector.broadcast %79 : vector<1x1x8xf32> to vector<12x8x8xf32>
    %81 = arith.mulf %76, %80 : vector<12x8x8xf32>
    %82 = arith.addf %71, %81 : vector<12x8x8xf32>
    %c1_i32 = arith.constant 1 : i32
    %83 = tpu.dynamic_rotate %64 by %c1_i32 dim 1 : vector<12x8x8xf32>, i32 -> vector<12x8x8xf32>
    %c1_i32_31 = arith.constant 1 : i32
    %84 = vector.broadcast %c1_i32_31 : i32 to vector<12x8x8xi32>
    %85 = arith.cmpi sge, %66, %84 : vector<12x8x8xi32>
    %cst_32 = arith.constant 0.000000e+00 : f32
    %86 = vector.broadcast %cst_32 : f32 to vector<12x8x8xf32>
    %87 = arith.select %85, %83, %86 : vector<12x8x8xi1>, vector<12x8x8xf32>
    %88 = vector.extract_strided_slice %65 {offsets = [1, 0], sizes = [1, 8], strides = [1, 1]} : vector<5x8xf32> to vector<1x8xf32>
    %89 = vector.shape_cast %88 : vector<1x8xf32> to vector<8xf32>
    %90 = vector.shape_cast %89 : vector<8xf32> to vector<1x1x8xf32>
    %91 = vector.broadcast %90 : vector<1x1x8xf32> to vector<12x8x8xf32>
    %92 = arith.mulf %87, %91 : vector<12x8x8xf32>
    %93 = arith.addf %82, %92 : vector<12x8x8xf32>
    %c7_i32 = arith.constant 7 : i32
    %94 = tpu.dynamic_rotate %64 by %c7_i32 dim 1 : vector<12x8x8xf32>, i32 -> vector<12x8x8xf32>
    %c7_i32_33 = arith.constant 7 : i32
    %95 = vector.broadcast %c7_i32_33 : i32 to vector<12x8x8xi32>
    %96 = arith.cmpi slt, %66, %95 : vector<12x8x8xi32>
    %cst_34 = arith.constant 0.000000e+00 : f32
    %97 = vector.broadcast %cst_34 : f32 to vector<12x8x8xf32>
    %98 = arith.select %96, %94, %97 : vector<12x8x8xi1>, vector<12x8x8xf32>
    %99 = vector.extract_strided_slice %65 {offsets = [3, 0], sizes = [1, 8], strides = [1, 1]} : vector<5x8xf32> to vector<1x8xf32>
    %100 = vector.shape_cast %99 : vector<1x8xf32> to vector<8xf32>
    %101 = vector.shape_cast %100 : vector<8xf32> to vector<1x1x8xf32>
    %102 = vector.broadcast %101 : vector<1x1x8xf32> to vector<12x8x8xf32>
    %103 = arith.mulf %98, %102 : vector<12x8x8xf32>
    %104 = arith.addf %93, %103 : vector<12x8x8xf32>
    %c6_i32 = arith.constant 6 : i32
    %105 = tpu.dynamic_rotate %64 by %c6_i32 dim 1 : vector<12x8x8xf32>, i32 -> vector<12x8x8xf32>
    %c6_i32_35 = arith.constant 6 : i32
    %106 = vector.broadcast %c6_i32_35 : i32 to vector<12x8x8xi32>
    %107 = arith.cmpi slt, %66, %106 : vector<12x8x8xi32>
    %cst_36 = arith.constant 0.000000e+00 : f32
    %108 = vector.broadcast %cst_36 : f32 to vector<12x8x8xf32>
    %109 = arith.select %107, %105, %108 : vector<12x8x8xi1>, vector<12x8x8xf32>
    %110 = vector.extract_strided_slice %65 {offsets = [4, 0], sizes = [1, 8], strides = [1, 1]} : vector<5x8xf32> to vector<1x8xf32>
    %111 = vector.shape_cast %110 : vector<1x8xf32> to vector<8xf32>
    %112 = vector.shape_cast %111 : vector<8xf32> to vector<1x1x8xf32>
    %113 = vector.broadcast %112 : vector<1x1x8xf32> to vector<12x8x8xf32>
    %114 = arith.mulf %109, %113 : vector<12x8x8xf32>
    %115 = arith.addf %104, %114 : vector<12x8x8xf32>
    %c0_37 = arith.constant 0 : index
    %c0_38 = arith.constant 0 : index
    %116 = vector.load %arg9[%c0_37, %c0_38] : memref<5x8xf32, #tpu.memory_space<vmem>>, vector<5x8xf32>
    %117 = vector.extract_strided_slice %115 {offsets = [0, 0, 0], sizes = [8, 8, 8], strides = [1, 1, 1]} : vector<12x8x8xf32> to vector<8x8x8xf32>
    %118 = vector.extract_strided_slice %116 {offsets = [0, 0], sizes = [1, 8], strides = [1, 1]} : vector<5x8xf32> to vector<1x8xf32>
    %119 = vector.shape_cast %118 : vector<1x8xf32> to vector<8xf32>
    %120 = vector.shape_cast %119 : vector<8xf32> to vector<1x1x8xf32>
    %121 = vector.broadcast %120 : vector<1x1x8xf32> to vector<8x8x8xf32>
    %122 = arith.mulf %117, %121 : vector<8x8x8xf32>
    %123 = vector.extract_strided_slice %115 {offsets = [1, 0, 0], sizes = [8, 8, 8], strides = [1, 1, 1]} : vector<12x8x8xf32> to vector<8x8x8xf32>
    %124 = vector.extract_strided_slice %116 {offsets = [1, 0], sizes = [1, 8], strides = [1, 1]} : vector<5x8xf32> to vector<1x8xf32>
    %125 = vector.shape_cast %124 : vector<1x8xf32> to vector<8xf32>
    %126 = vector.shape_cast %125 : vector<8xf32> to vector<1x1x8xf32>
    %127 = vector.broadcast %126 : vector<1x1x8xf32> to vector<8x8x8xf32>
    %128 = arith.mulf %123, %127 : vector<8x8x8xf32>
    %129 = arith.addf %122, %128 : vector<8x8x8xf32>
    %130 = vector.extract_strided_slice %115 {offsets = [2, 0, 0], sizes = [8, 8, 8], strides = [1, 1, 1]} : vector<12x8x8xf32> to vector<8x8x8xf32>
    %131 = vector.extract_strided_slice %116 {offsets = [2, 0], sizes = [1, 8], strides = [1, 1]} : vector<5x8xf32> to vector<1x8xf32>
    %132 = vector.shape_cast %131 : vector<1x8xf32> to vector<8xf32>
    %133 = vector.shape_cast %132 : vector<8xf32> to vector<1x1x8xf32>
    %134 = vector.broadcast %133 : vector<1x1x8xf32> to vector<8x8x8xf32>
    %135 = arith.mulf %130, %134 : vector<8x8x8xf32>
    %136 = arith.addf %129, %135 : vector<8x8x8xf32>
    %137 = vector.extract_strided_slice %115 {offsets = [3, 0, 0], sizes = [8, 8, 8], strides = [1, 1, 1]} : vector<12x8x8xf32> to vector<8x8x8xf32>
    %138 = vector.extract_strided_slice %116 {offsets = [3, 0], sizes = [1, 8], strides = [1, 1]} : vector<5x8xf32> to vector<1x8xf32>
    %139 = vector.shape_cast %138 : vector<1x8xf32> to vector<8xf32>
    %140 = vector.shape_cast %139 : vector<8xf32> to vector<1x1x8xf32>
    %141 = vector.broadcast %140 : vector<1x1x8xf32> to vector<8x8x8xf32>
    %142 = arith.mulf %137, %141 : vector<8x8x8xf32>
    %143 = arith.addf %136, %142 : vector<8x8x8xf32>
    %144 = vector.extract_strided_slice %115 {offsets = [4, 0, 0], sizes = [8, 8, 8], strides = [1, 1, 1]} : vector<12x8x8xf32> to vector<8x8x8xf32>
    %145 = vector.extract_strided_slice %116 {offsets = [4, 0], sizes = [1, 8], strides = [1, 1]} : vector<5x8xf32> to vector<1x8xf32>
    %146 = vector.shape_cast %145 : vector<1x8xf32> to vector<8xf32>
    %147 = vector.shape_cast %146 : vector<8xf32> to vector<1x1x8xf32>
    %148 = vector.broadcast %147 : vector<1x1x8xf32> to vector<8x8x8xf32>
    %149 = arith.mulf %144, %148 : vector<8x8x8xf32>
    %150 = arith.addf %143, %149 : vector<8x8x8xf32>
    %151 = arith.negf %150 : vector<8x8x8xf32>
    %152 = math.exp %151 : vector<8x8x8xf32>
    %cst_39 = arith.constant 1.000000e+00 : f32
    %153 = vector.broadcast %cst_39 : f32 to vector<8x8x8xf32>
    %154 = arith.addf %153, %152 : vector<8x8x8xf32>
    %155 = arith.divf %153, %154 : vector<8x8x8xf32>
    %156 = tpu.concatenate %155, %155 in 2 : vector<8x8x8xf32>, vector<8x8x8xf32> -> vector<8x8x16xf32>
    %c0_40 = arith.constant 0 : index
    %c0_41 = arith.constant 0 : index
    %c0_42 = arith.constant 0 : index
    %c0_43 = arith.constant 0 : index
    %157 = vector.load %arg10[%c0_40, %c0_41, %c0_42, %c0_43] : memref<1x8x8x16xf32, #tpu.memory_space<vmem>>, vector<1x8x8x16xf32>
    %158 = vector.shape_cast %157 : vector<1x8x8x16xf32> to vector<8x8x16xf32>
    %159 = vector.shape_cast %156 : vector<8x8x16xf32> to vector<1x8x8x16xf32>
    tpu.vector_store %arg10[%c0_40, %c0_41, %c0_42, %c0_43], %159 {strides = array<i32>} : memref<1x8x8x16xf32, #tpu.memory_space<vmem>>, vector<1x8x8x16xf32>,
    return
  }
  func.func @transform_0(%arg0: i32, %arg1: i32) -> (i32, i32, i32, i32) {
    %c0_i32 = arith.constant 0 : i32
    %c0_i32_0 = arith.constant 0 : i32
    %c0_i32_1 = arith.constant 0 : i32
    return %arg0, %arg1, %c0_i32, %c0_i32_0 : i32, i32, i32, i32
  }
  func.func @transform_1(%arg0: i32, %arg1: i32) -> (i32, i32, i32, i32) {
    %c8_i32 = arith.constant 8 : i32
    %0 = arith.muli %arg1, %c8_i32 : i32
    %c2_i32 = arith.constant 2 : i32
    %1 = arith.subi %0, %c2_i32 : i32
    %c0_i32 = arith.constant 0 : i32
    %2 = arith.maxsi %1, %c0_i32 : i32
    %c0_i32_0 = arith.constant 0 : i32
    %c0_i32_1 = arith.constant 0 : i32
    %c0_i32_2 = arith.constant 0 : i32
    return %arg0, %2, %c0_i32_0, %c0_i32_1 : i32, i32, i32, i32
  }
  func.func @transform_2(%arg0: i32, %arg1: i32) -> (i32, i32, i32, i32) {
    %c8_i32 = arith.constant 8 : i32
    %0 = arith.muli %arg1, %c8_i32 : i32
    %c1_i32 = arith.constant 1 : i32
    %1 = arith.subi %0, %c1_i32 : i32
    %c0_i32 = arith.constant 0 : i32
    %2 = arith.maxsi %1, %c0_i32 : i32
    %c0_i32_0 = arith.constant 0 : i32
    %c0_i32_1 = arith.constant 0 : i32
    %c0_i32_2 = arith.constant 0 : i32
    return %arg0, %2, %c0_i32_0, %c0_i32_1 : i32, i32, i32, i32
  }
  func.func @transform_3(%arg0: i32, %arg1: i32) -> (i32, i32, i32, i32) {
    %c1_i32 = arith.constant 1 : i32
    %0 = arith.addi %arg1, %c1_i32 : i32
    %c8_i32 = arith.constant 8 : i32
    %1 = arith.muli %0, %c8_i32 : i32
    %c7_i32 = arith.constant 7 : i32
    %2 = arith.minsi %1, %c7_i32 : i32
    %c0_i32 = arith.constant 0 : i32
    %c0_i32_0 = arith.constant 0 : i32
    %c0_i32_1 = arith.constant 0 : i32
    return %arg0, %2, %c0_i32, %c0_i32_0 : i32, i32, i32, i32
  }
  func.func @transform_4(%arg0: i32, %arg1: i32) -> (i32, i32, i32, i32) {
    %c1_i32 = arith.constant 1 : i32
    %0 = arith.addi %arg1, %c1_i32 : i32
    %c8_i32 = arith.constant 8 : i32
    %1 = arith.muli %0, %c8_i32 : i32
    %c1_i32_0 = arith.constant 1 : i32
    %2 = arith.addi %1, %c1_i32_0 : i32
    %c7_i32 = arith.constant 7 : i32
    %3 = arith.minsi %2, %c7_i32 : i32
    %c0_i32 = arith.constant 0 : i32
    %c0_i32_1 = arith.constant 0 : i32
    %c0_i32_2 = arith.constant 0 : i32
    return %arg0, %3, %c0_i32, %c0_i32_1 : i32, i32, i32, i32
  }
  func.func @transform_5(%arg0: i32, %arg1: i32) -> (i32, i32) {
    %c0_i32 = arith.constant 0 : i32
    %c0_i32_0 = arith.constant 0 : i32
    %c0_i32_1 = arith.constant 0 : i32
    return %c0_i32, %c0_i32_0 : i32, i32
  }
  func.func @transform_6(%arg0: i32, %arg1: i32) -> (i32, i32) {
    %c0_i32 = arith.constant 0 : i32
    %c0_i32_0 = arith.constant 0 : i32
    %c0_i32_1 = arith.constant 0 : i32
    return %c0_i32, %c0_i32_0 : i32, i32
  }
  func.func @transform_7(%arg0: i32, %arg1: i32) -> (i32, i32) {
    %c0_i32 = arith.constant 0 : i32
    %c0_i32_0 = arith.constant 0 : i32
    %c0_i32_1 = arith.constant 0 : i32
    return %c0_i32, %c0_i32_0 : i32, i32
  }
  func.func @transform_8(%arg0: i32, %arg1: i32) -> (i32, i32, i32, i32) {
    %c0_i32 = arith.constant 0 : i32
    %c0_i32_0 = arith.constant 0 : i32
    %c0_i32_1 = arith.constant 0 : i32
    return %arg0, %arg1, %c0_i32, %c0_i32_0 : i32, i32, i32, i32
  }
}

</mosaic_0001>

<bundles_post_ra>
// kernel: tpu_custom_call.1
= control target key start
LH: loop header
LB: loop body
LE: loop exit
PB: predicated region body
PF: predicated region fallthrough
CT: control target
= control target key end

     0   :  { %13 = vsyncpa [#allocation3], 0  ;;  %s2269_s0 = inlined_call_operand.vmem [shape: f32[4,16,8,8], index: 0, kind: input, shape index: {}]   ;;  %s2270_s1 = inlined_call_operand.vmem [shape: f32[4,16,8,8], index: 1, kind: input, shape index: {}]   ;;  %s2271_s2 = inlined_call_operand.vmem [shape: f32[4,16,8,8], index: 2, kind: input, shape index: {}]   ;;  %s2272_s3 = inlined_call_operand.vmem [shape: f32[4,16,8,8], index: 3, kind: input, shape index: {}]   ;;  %s2273_s4 = inlined_call_operand.vmem [shape: f32[4,16,8,8], index: 4, kind: input, shape index: {}]   ;;  %s2274_s5 = inlined_call_operand.vmem [shape: f32[8,8], index: 5, kind: input, shape index: {}]   ;;  %s2275_s6 = inlined_call_operand.vmem [shape: f32[5,8], index: 6, kind: input, shape index: {}]   ;;  %s2276_s7 = inlined_call_operand.vmem [shape: f32[5,8], index: 7, kind: input, shape index: {}]   ;;  %s2277_s8 = inlined_call_operand.hbm [shape: f32[4,8,8,16], index: 8, kind: output, shape index: {}]  }
   0x1   :  { %15 = vsyncpa [#allocation3 + $0x1], 0  ;;  %s1681_s27 = smov 0   ;;  %s1683_s28 = smov 0  }
   0x2   :  { %s1685_s29 = smov 0   ;;  %s1687_s30 = smov 0  }
   0x3   :  { %s1689_s9 = smov 0   ;;  %s1691_s10 = smov 0  }
   0x4 LB: > { %s1411_s11 = sadd.s32 4294967295, %s1632_s10   ;;  %s1412_s12 = sadd.s32 4294967294, %s1632_s10   ;;  %s1632_s10 = sphi %s1691_s10, %s21_s10   ;;  %s1628_s9 = sphi %s1689_s9, %s2294_s9   ;;  %s1624_s30 = sphi %s1687_s30, %s2293_s30   ;;  %s1620_s29 = sphi %s1685_s29, %s2292_s29   ;;  %s1616_s28 = sphi %s1683_s28, %s2291_s28   ;;  %s1612_s27 = sphi %s1681_s27, %s2290_s27  }
   0x5   : > { %s33_s13 = sadd.s32 1, %s1628_s9  ;;  %s279_s14 = sadd.s32 1, %s1620_s29 }
   0x6   : > { %p35_p0 = scmp.ge.s32.totalorder %s33_s13, 4  ;;  %p289_p1 = scmp.ne.s32.totalorder %s1620_s29, %s1616_s28 }
   0x7   : > { %p290_p2 = scmp.eq.s32.totalorder %s1411_s11, 3  ;;  %p295_p3 = scmp.ne.s32.totalorder %s1616_s28, %s1612_s27 }
   0x8   : > { %s2296_s13 = smov (%p35_p0, %s33_s13), 0  ;;  %p296_p5 = scmp.eq.s32.totalorder %s1412_s12, 3 }
   0x9   : > { %p1721_p4 = por %p290_p2, %p289_p1  ;;  %s274_s16 = ssub.s32 %s1628_s9, %s2296_s13 }
   0xa   : > { %p1415_p6 = scmp.ge.s32.totalorder %s1632_s10, 1  ;;  %p277_p7 = scmp.eq.s32.totalorder %s274_s16, 0 }
   0xb   : > { %p1728_p8 = por %p296_p5, %p295_p3  ;;  %p422_p9 = scmp.lt.s32.totalorder %s1632_s10, 5 }
   0xc   : > { %s1734_s18 = scalar_select %p277_p7, %s1620_s29, %s279_s14  }
   0xd   : > { %p423_p10 = pnand %p1415_p6, %p422_p9 }
   0xe   : > { %p514_p11 = scmp.lt.s32.totalorder (!%p423_p10), %s1624_s30, 3  ;;  %s1574_s26 = scalar_lea.hbm (!%p423_p10), %s2277_s8, 256 }
   0xf   : > { %426 = sbr.rel (%p423_p10) target bundleno = 386 (0x182), region = 52 }
  0x14   : > { %v656_v0 = vld [vmem:[%s2274_s5] sm:$0xff]  ;;  %s515_s21 = scalar_select %p514_p11, %s1624_s30, 3  ;;  %vm657_vm0 = vcmask 64512   ;;  %v748_v49 = vlaneseq }
  0x15   : > { %709 = vmatpush.msra.mxu0 %v656_v0  ;;  %1462 = vmatpush.msra.mxu1 %v656_v0  ;;  %v747_v51 = vld [vmem:[%s2275_s6] sm:$0x1f] }
  0x16   : > { %1463 = vmatpush.msra.mxu2 %v656_v0  ;;  %1464 = vmatpush.msra.mxu3 %v656_v0  ;;  %s1741_s22 = sshll.u32 %s515_s21, 7  ;;  %v1796_v50 = vshrl.u32 %v748_v49, 7  ;;  %v963_v52 = vld [vmem:[%s2276_s7] sm:$0x1f]  ;;  %v1804_v53 = vperm.slane %v747_v51, 2  ;;  %v1807_v54 = vperm.slane %v747_v51, 0 }
  0x17   : > { %s1747_s25 = scalar_lea.vmem %s2269_s0, %s1741_s22  ;;  %s535_s12 = scalar_lea.vmem %s2270_s1, %s1741_s22  ;;  %v1810_v55 = vperm.slane %v747_v51, 1  ;;  %v1813_v57 = vperm.slane %v747_v51, 3  ;;  %v1816_v58 = vperm.slane %v747_v51, 4  ;;  %v1818_v59 = vperm.slane %v963_v52, 0 }
  0x18   : > { %v636_v1 = vld [vmem:[%s535_s12] sm:$0xff]  ;;  %v637_v2 = vld [vmem:[%s535_s12 + $0x8] sm:$0xff]  ;;  %v606_v3 = vld [vmem:[%s1747_s25 + $0x10] sm:$0xff]  ;;  %s553_s19 = scalar_lea.vmem %s2271_s2, %s1741_s22  ;;  %s1456_s20 = sadd.s32 112, %s1741_s22  ;;  %vm775_vm1 = vcmp.ge.s32.totalorder %v1796_v50, 2  ;;  %vm825_vm2 = vcmp.ge.s32.totalorder %v1796_v50, 1 }
  0x19   : > { %v638_v4 = vadd.f32 %v637_v2, %v636_v1  ;;  %v607_v5 = vld [vmem:[%s1747_s25 + $0x18] sm:$0xff]  ;;  %v612_v6 = vld [vmem:[%s1747_s25 + $0x40] sm:$0xff]  ;;  %v613_v7 = vld [vmem:[%s1747_s25 + $0x48] sm:$0xff]  ;;  %s571_s24 = scalar_lea.vmem %s2272_s3, %s1456_s20  ;;  %s590_s12 = scalar_lea.vmem %s2273_s4, %s1456_s20  ;;  %vm875_vm3 = vcmp.lt.s32.totalorder %v1796_v50, 7  ;;  %vm925_vm4 = vcmp.lt.s32.totalorder %v1796_v50, 6  ;;  %v1820_v0 = vperm.slane %v963_v52, 1 }
  0x1a   : > { %v621_v8 = vadd.f32 %v607_v5, %v606_v3  ;;  %v624_v9 = vadd.f32 %v613_v7, %v612_v6  ;;  %v618_v10 = vld [vmem:[%s1747_s25 + $0x70] sm:$0xff]  ;;  %v619_v11 = vld [vmem:[%s1747_s25 + $0x78] sm:$0xff]  ;;  %v642_v12 = vld [vmem:[%s553_s19] sm:$0xff]  ;;  %s510_s20 = sand.u32 1, %s1616_s28  }
  0x1b   : > { %v641_v13 = vmul.f32 0.0, %v638_v4  ;;  %v627_v14 = vadd.f32 %v619_v11, %v618_v10  ;;  %v643_v15 = vld [vmem:[%s553_s19 + $0x8] sm:$0xff]  ;;  %v608_v16 = vld [vmem:[%s1747_s25 + $0x20] sm:$0xff]  ;;  %v614_v20 = vld [vmem:[%s1747_s25 + $0x50] sm:$0xff]  ;;  %v1822_v4 = vperm.slane %v963_v52, 2  ;;  %s1634_s19 = smov 8  }
  0x1c   : > { %v609_v17 = vld [vmem:[%s1747_s25 + $0x28] sm:$0xff]  ;;  %v629_v18 = vmul.f32 0.5, %v621_v8  ;;  %v632_v19 = vmul.f32 0.5, %v624_v9  ;;  %v615_v21 = vld [vmem:[%s1747_s25 + $0x58] sm:$0xff]  ;;  %v646_v22 = vld [vmem:[%s571_s24] sm:$0xff]  ;;  %v644_v24 = vadd.f32 %v643_v15, %v642_v12  ;;  %v1834_v12 = vperm.slane %v963_v52, 3 }
  0x1d   : > { %1427 = vmatmul.msk.f32.vlgmr.msra.gmra.mxu0 %vm657_vm0, %v641_v13  ;;  %v635_v23 = vmul.f32 0.5, %v627_v14  ;;  %v647_v25 = vld [vmem:[%s571_s24 + $0x8] sm:$0xff]  ;;  %v622_v26 = vadd.f32 %v609_v17, %v608_v16  ;;  %v625_v27 = vadd.f32 %v615_v21, %v614_v20  ;;  %v604_v32 = vld [vmem:[%s1747_s25] sm:$0xff]  ;;  %v610_v34 = vld [vmem:[%s1747_s25 + $0x30] sm:$0xff]  ;;  %v1841_v16 = vperm.slane %v963_v52, 4  ;;  %s1416_s21 = sshll.u32 %s510_s20, 6 }
  0x1e   : > { %1430 = vmatmul.msk.f32.vlgmr.msra.gmra.mxu1 %vm657_vm0, %v629_v18  ;;  %1433 = vmatmul.msk.f32.vlgmr.msra.gmra.mxu2 %vm657_vm0, %v632_v19  ;;  %v648_v28 = vadd.f32 %v647_v25, %v646_v22  ;;  %v645_v29 = vmul.f32 0.0, %v644_v24  ;;  %v605_v33 = vld [vmem:[%s1747_s25 + $0x8] sm:$0xff]  ;;  %v611_v36 = vld [vmem:[%s1747_s25 + $0x38] sm:$0xff]  ;;  %v616_v37 = vld [vmem:[%s1747_s25 + $0x60] sm:$0xff]  ;;  %s512_s23 = scalar_lea.vmem [#allocation2], %s1416_s21  ;;  %s1459_s24 = sshll.u32 %s1624_s30, 6 }
  0x1f   : > { %1436 = vmatmul.msk.f32.vlgmr.msra.gmra.mxu3 %vm657_vm0, %v635_v23  ;;  %v630_v30 = vmul.f32 0.5, %v622_v26  ;;  %v633_v31 = vmul.f32 0.5, %v625_v27  ;;  %v617_v38 = vld [vmem:[%s1747_s25 + $0x68] sm:$0xff]  ;;  %v652_v39 = vld [vmem:[%s590_s12] sm:$0xff]  ;;  %v620_v41 = vadd.f32 %v605_v33, %v604_v32  ;;  %v623_v42 = vadd.f32 %v611_v36, %v610_v34  ;;  %s1257_s22 = sshll.u32 %s512_s23, 4  ;;  %s1243_s30 = scalar_lea.sflag [#allocation3], %s510_s20  ;;  %s1258_s22 = int_to_ptr.vmem [resolvable:$true] %s1257_s22 }
  0x20   : > { %v651_v35 = vmul.f32 0.0, %v648_v28  ;;  %v653_v40 = vld [vmem:[%s590_s12 + $0x8] sm:$0xff]  ;;  %v626_v43 = vadd.f32 %v617_v38, %v616_v37  ;;  %s1256_s12 = scalar_lea.hbm %s2277_s8, %s1459_s24 }
  0x21   : > { %v654_v44 = vadd.f32 %v653_v40, %v652_v39  ;;  %v628_v45 = vmul.f32 0.5, %v620_v41  ;;  %v631_v46 = vmul.f32 0.5, %v623_v42  ;;  %s1259_s25 = sshll.u32 %s1256_s12, 4  ;;  %s1260_s25 = int_to_ptr.hbm [resolvable:$true] %s1259_s25 }
  0x22   : > { %v634_v47 = vmul.f32 0.5, %v626_v43  ;;  %s1568_s14 = sshra.s32 %s1260_s25, 4  ;;  %s1569_s14 = int_to_ptr.hbm [resolvable:$true] %s1568_s14 }
  0x23   : > { %v655_v48 = vmul.f32 0.0, %v654_v44  ;;  %s1570_s16 = scalar_lea.hbm %s1569_s14, 64  ;;  %p1575_p1 = scmp.lt.s32.totalorder %s1569_s14, %s2277_s8 }
  0x24   : > { %p1571_p12 = scmp.ne.s32.totalorder %s1569_s14, %s1570_s16  ;;  %p1576_p2 = scmp.lt.s32.totalorder %s1574_s26, %s1570_s16 }
  0x25   : > { %1428 = vmatmul.msk.f32.gmra.mxu0 %vm657_vm0, %v645_v29 }
  0x26   : > { %1431 = vmatmul.msk.f32.gmra.mxu1 %vm657_vm0, %v630_v30  ;;  %1434 = vmatmul.msk.f32.gmra.mxu2 %vm657_vm0, %v633_v31  ;;  %p1572_p13 = pnand %p1571_p12, %p1721_p4  ;;  %p1577_p3 = por %p1576_p2, %p1575_p1 }
  0x27   : > { %1437 = vmatmul.msk.f32.gmra.mxu3 %vm657_vm0, %v651_v35 }
  0x28   : > { %p1573_p0 = pneg %p1572_p13 }
  0x2a   : > { %p1578_p5 = pnand %p1577_p3, %p1573_p0 }
  0x2d   : > { %1429 = vmatmul.msk.f32.gmra.mxu0 %vm657_vm0, %v628_v45 }
  0x2e   : > { %1432 = vmatmul.msk.f32.gmra.mxu1 %vm657_vm0, %v631_v46  ;;  %1435 = vmatmul.msk.f32.gmra.mxu2 %vm657_vm0, %v634_v47 }
  0x2f   : > { %1438 = vmatmul.msk.f32.gmra.mxu3 %vm657_vm0, %v655_v48 }
  0x9a   : > { %v711_v56 = vpop.f32.mrf.mxu0 }
  0x9b   : > { %v763_v60 = vrot.slane %v711_v56, 6  ;;  %v813_v61 = vrot.slane %v711_v56, 7  ;;  %v863_v62 = vrot.slane %v711_v56, 1  ;;  %v720_v63 = vpop.f32.mrf.mxu1  ;;  %v913_v1 = vrot.slane %v711_v56, 2 }
  0x9c   : > { %v766_v2 = vrot.slane %v720_v63, 6  ;;  %v816_v3 = vrot.slane %v720_v63, 7  ;;  %v866_v8 = vrot.slane %v720_v63, 1  ;;  %v751_v9 = vmul.f32 %v1804_v53, %v711_v56 }
  0x9d   : > { %v776_v5 = vsel %vm775_vm1, %v763_v60, 0.0  ;;  %v826_v6 = vsel %vm825_vm2, %v813_v61, 0.0  ;;  %v876_v7 = vsel %vm875_vm3, %v863_v62, 0.0  ;;  %v926_v11 = vsel %vm925_vm4, %v913_v1, 0.0 }
  0x9e   : > { %v789_v10 = vmul.f32 %v1807_v54, %v776_v5  ;;  %v754_v13 = vmul.f32 %v1804_v53, %v720_v63  ;;  %v779_v14 = vsel %vm775_vm1, %v766_v2, 0.0  ;;  %v829_v15 = vsel %vm825_vm2, %v816_v3, 0.0 }
  0x9f   : > { %v839_v18 = vmul.f32 %v1810_v55, %v826_v6  ;;  %v889_v19 = vmul.f32 %v1813_v57, %v876_v7  ;;  %v792_v20 = vmul.f32 %v1807_v54, %v779_v14  ;;  %v939_v21 = vmul.f32 %v1816_v58, %v926_v11 }
  0xa0   : > { %v801_v17 = vadd.f32 %v789_v10, %v751_v9  ;;  %v842_v22 = vmul.f32 %v1810_v55, %v829_v15  ;;  %v879_v23 = vsel %vm875_vm3, %v866_v8, 0.0  ;;  %v916_v24 = vrot.slane %v720_v63, 2 }
  0xa1   : > { %v729_v25 = vpop.f32.mrf.mxu2  ;;  %v804_v27 = vadd.f32 %v792_v20, %v754_v13  ;;  %v892_v36 = vmul.f32 %v1813_v57, %v879_v23 }
  0xa2   : > { %v851_v26 = vadd.f32 %v839_v18, %v801_v17  ;;  %v757_v28 = vmul.f32 %v1804_v53, %v729_v25  ;;  %v769_v29 = vrot.slane %v729_v25, 6  ;;  %v929_v30 = vsel %vm925_vm4, %v916_v24, 0.0  ;;  %v714_v38 = vpop.f32.mrf.mxu0  ;;  %v738_v23 = vpop.f32.mrf.mxu3 }
  0xa3   : > { %v819_v31 = vrot.slane %v729_v25, 7  ;;  %v869_v32 = vrot.slane %v729_v25, 1  ;;  %v919_v33 = vrot.slane %v729_v25, 2  ;;  %v854_v35 = vadd.f32 %v842_v22, %v804_v27  ;;  %v723_v52 = vpop.f32.mrf.mxu1 }
  0xa4   : > { %v901_v34 = vadd.f32 %v889_v19, %v851_v26  ;;  %v782_v37 = vsel %vm775_vm1, %v769_v29, 0.0  ;;  %v942_v45 = vmul.f32 %v1816_v58, %v929_v30  ;;  %v764_v51 = vrot.slane %v714_v38, 6 }
  0xa5   : > { %v795_v39 = vmul.f32 %v1807_v54, %v782_v37  ;;  %v832_v40 = vsel %vm825_vm2, %v819_v31, 0.0  ;;  %v882_v41 = vsel %vm875_vm3, %v869_v32, 0.0  ;;  %v932_v42 = vsel %vm925_vm4, %v919_v33, 0.0 }
  0xa6   : > { %v951_v43 = vadd.f32 %v939_v21, %v901_v34  ;;  %v904_v44 = vadd.f32 %v892_v36, %v854_v35  ;;  %v845_v46 = vmul.f32 %v1810_v55, %v832_v40  ;;  %v895_v48 = vmul.f32 %v1813_v57, %v882_v41 }
  0xa7   : > { %v807_v47 = vadd.f32 %v795_v39, %v757_v28  ;;  %v945_v49 = vmul.f32 %v1816_v58, %v932_v42  ;;  %v752_v60 = vmul.f32 %v1804_v53, %v714_v38  ;;  %v814_v61 = vrot.slane %v714_v38, 7 }
  0xa8   : > { %v1867_v56 = vadd.f32 %v942_v45, %v904_v44  ;;  %v864_v62 = vrot.slane %v714_v38, 1  ;;  %v1871_v63 = vmul.f32 %v1818_v59, %v951_v43  ;;  %v777_v2 = vsel %vm775_vm1, %v764_v51, 0.0 }
  0xa9   : > { %v857_v1 = vadd.f32 %v845_v46, %v807_v47  ;;  %v914_v3 = vrot.slane %v714_v38, 2  ;;  %v790_v5 = vmul.f32 %v1807_v54, %v777_v2  ;;  %v827_v6 = vsel %vm825_vm2, %v814_v61, 0.0  ;;  %v732_v36 = vpop.f32.mrf.mxu2 }
  0xaa   : > { %v877_v7 = vsel %vm875_vm3, %v864_v62, 0.0  ;;  %v755_v8 = vmul.f32 %v1804_v53, %v723_v52  ;;  %v1883_v9 = vmul.f32 %v1818_v59, %v1867_v56  ;;  %v840_v11 = vmul.f32 %v1810_v55, %v827_v6 }
  0xab   : > { %v907_v10 = vadd.f32 %v895_v48, %v857_v1  ;;  %v927_v13 = vsel %vm925_vm4, %v914_v3, 0.0  ;;  %v802_v14 = vadd.f32 %v790_v5, %v752_v60  ;;  %v890_v15 = vmul.f32 %v1813_v57, %v877_v7  ;;  %v717_v3 = vpop.f32.mrf.mxu0 }
  0xac   : > { %v767_v17 = vrot.slane %v723_v52, 6  ;;  %v817_v18 = vrot.slane %v723_v52, 7  ;;  %v940_v20 = vmul.f32 %v1816_v58, %v927_v13  ;;  %v867_v21 = vrot.slane %v723_v52, 1 }
  0xad   : > { %v1889_v19 = vadd.f32 %v945_v49, %v907_v10  ;;  %v917_v22 = vrot.slane %v723_v52, 2  ;;  %v852_v24 = vadd.f32 %v840_v11, %v802_v14  ;;  %v772_v27 = vrot.slane %v738_v23, 6 }
  0xae   : > { %v780_v25 = vsel %vm775_vm1, %v767_v17, 0.0  ;;  %v830_v26 = vsel %vm825_vm2, %v817_v18, 0.0  ;;  %v880_v30 = vsel %vm875_vm3, %v867_v21, 0.0  ;;  %v760_v31 = vmul.f32 %v1804_v53, %v738_v23 }
  0xaf   : > { %v1898_v28 = vmul.f32 %v1820_v0, %v1889_v19  ;;  %v793_v29 = vmul.f32 %v1807_v54, %v780_v25  ;;  %v902_v32 = vadd.f32 %v890_v15, %v852_v24  ;;  %v843_v33 = vmul.f32 %v1810_v55, %v830_v26 }
  0xb0   : > { %v930_v34 = vsel %vm925_vm4, %v917_v22, 0.0  ;;  %v785_v35 = vsel %vm775_vm1, %v772_v27, 0.0  ;;  %v893_v38 = vmul.f32 %v1813_v57, %v880_v30  ;;  %v822_v40 = vrot.slane %v738_v23, 7 }
  0xb1   : > { %v805_v37 = vadd.f32 %v793_v29, %v755_v8  ;;  %v798_v39 = vmul.f32 %v1807_v54, %v785_v35  ;;  %v952_v41 = vadd.f32 %v940_v20, %v902_v32  ;;  %v943_v42 = vmul.f32 %v1816_v58, %v930_v34 }
  0xb2   : > { %v872_v43 = vrot.slane %v738_v23, 1  ;;  %v922_v44 = vrot.slane %v738_v23, 2  ;;  %v835_v47 = vsel %vm825_vm2, %v822_v40, 0.0  ;;  %v770_v48 = vrot.slane %v732_v36, 6 }
  0xb3   : > { %v855_v45 = vadd.f32 %v843_v33, %v805_v37  ;;  %v810_v46 = vadd.f32 %v798_v39, %v760_v31  ;;  %v974_v49 = vmul.f32 %v1820_v0, %v952_v41  ;;  %v848_v51 = vmul.f32 %v1810_v55, %v835_v47 }
  0xb4   : > { %v885_v52 = vsel %vm875_vm3, %v872_v43, 0.0  ;;  %v758_v60 = vmul.f32 %v1804_v53, %v732_v36  ;;  %v935_v1 = vsel %vm925_vm4, %v922_v44, 0.0  ;;  %v783_v2 = vsel %vm775_vm1, %v770_v48, 0.0 }
  0xb5   : > { %v905_v61 = vadd.f32 %v893_v38, %v855_v45  ;;  %v898_v62 = vmul.f32 %v1813_v57, %v885_v52  ;;  %v1925_v5 = vmul.f32 %v1818_v59, %v952_v41  ;;  %v860_v6 = vadd.f32 %v848_v51, %v810_v46  ;;  %v726_v45 = vpop.f32.mrf.mxu1 }
  0xb6   : > { %v948_v7 = vmul.f32 %v1816_v58, %v935_v1  ;;  %v796_v8 = vmul.f32 %v1807_v54, %v783_v2  ;;  %v820_v11 = vrot.slane %v732_v36, 7  ;;  %v870_v13 = vrot.slane %v732_v36, 1 }
  0xb7   : > { %v1929_v10 = vadd.f32 %v943_v42, %v905_v61  ;;  %v920_v14 = vrot.slane %v732_v36, 2  ;;  %v1932_v15 = vadd.f32 %v974_v49, %v1871_v63  ;;  %v910_v17 = vadd.f32 %v898_v62, %v860_v6  ;;  %v741_v6 = vpop.f32.mrf.mxu3 }
  0xb8   : > { %v808_v18 = vadd.f32 %v796_v8, %v758_v60  ;;  %v765_v20 = vrot.slane %v717_v3, 6  ;;  %v833_v22 = vsel %vm825_vm2, %v820_v11, 0.0  ;;  %v883_v23 = vsel %vm875_vm3, %v870_v13, 0.0 }
  0xb9   : > { %v1936_v21 = vmul.f32 %v1818_v59, %v1929_v10  ;;  %v753_v24 = vmul.f32 %v1804_v53, %v717_v3  ;;  %v960_v25 = vadd.f32 %v948_v7, %v910_v17  ;;  %v846_v26 = vmul.f32 %v1810_v55, %v833_v22 }
  0xba   : > { %v896_v63 = vmul.f32 %v1813_v57, %v883_v23  ;;  %v933_v27 = vsel %vm925_vm4, %v920_v14, 0.0  ;;  %v1949_v29 = vmul.f32 %v1820_v0, %v1929_v10  ;;  %v778_v30 = vsel %vm775_vm1, %v765_v20, 0.0 }
  0xbb   : > { %v815_v31 = vrot.slane %v717_v3, 7  ;;  %v865_v32 = vrot.slane %v717_v3, 1  ;;  %v1954_v33 = vmul.f32 %v1822_v4, %v960_v25  ;;  %v1957_v34 = vmul.f32 %v1834_v12, %v960_v25 }
  0xbc   : > { %v858_v35 = vadd.f32 %v846_v26, %v808_v18  ;;  %v946_v36 = vmul.f32 %v1816_v58, %v933_v27  ;;  %v791_v37 = vmul.f32 %v1807_v54, %v778_v30  ;;  %v915_v40 = vrot.slane %v717_v3, 2 }
  0xbd   : > { %v828_v38 = vsel %vm825_vm2, %v815_v31, 0.0  ;;  %v878_v39 = vsel %vm875_vm3, %v865_v32, 0.0  ;;  %v1966_v41 = vmul.f32 %v1841_v16, %v960_v25  ;;  %v976_v48 = vmul.f32 %v1820_v0, %v1867_v56 }
  0xbe   : > { %v908_v42 = vadd.f32 %v896_v63, %v858_v35  ;;  %v841_v43 = vmul.f32 %v1810_v55, %v828_v38  ;;  %v891_v44 = vmul.f32 %v1813_v57, %v878_v39  ;;  %v803_v46 = vadd.f32 %v791_v37, %v753_v24 }
  0xbf   : > { %v928_v47 = vsel %vm925_vm4, %v915_v40, 0.0  ;;  %v992_v49 = vmul.f32 %v1822_v4, %v1867_v56  ;;  %v993_v60 = vmul.f32 %v1822_v4, %v1929_v10  ;;  %v1008_v61 = vmul.f32 %v1834_v12, %v1867_v56 }
  0xc0   : > { %v1976_v51 = vadd.f32 %v946_v36, %v908_v42  ;;  %v941_v52 = vmul.f32 %v1816_v58, %v928_v47  ;;  %v853_v62 = vadd.f32 %v841_v43, %v803_v46  ;;  %v1009_v1 = vmul.f32 %v1834_v12, %v1929_v10 }
  0xc1   : > { %v768_v2 = vrot.slane %v726_v45, 6  ;;  %v818_v3 = vrot.slane %v726_v45, 7  ;;  %v756_v7 = vmul.f32 %v1804_v53, %v726_v45  ;;  %v868_v8 = vrot.slane %v726_v45, 1 }
  0xc2   : > { %v918_v11 = vrot.slane %v726_v45, 2  ;;  %v773_v13 = vrot.slane %v741_v6, 6  ;;  %v903_v14 = vadd.f32 %v891_v44, %v853_v62  ;;  %v823_v56 = vrot.slane %v741_v6, 7  ;;  %v735_v62 = vpop.f32.mrf.mxu2 }
  0xc3   : > { %v781_v17 = vsel %vm775_vm1, %v768_v2, 0.0  ;;  %v831_v18 = vsel %vm825_vm2, %v818_v3, 0.0  ;;  %v881_v23 = vsel %vm875_vm3, %v868_v8, 0.0  ;;  %v761_v24 = vmul.f32 %v1804_v53, %v741_v6 }
  0xc4   : > { %v794_v20 = vmul.f32 %v1807_v54, %v781_v17  ;;  %v844_v22 = vmul.f32 %v1810_v55, %v831_v18  ;;  %v953_v25 = vadd.f32 %v941_v52, %v903_v14  ;;  %v894_v26 = vmul.f32 %v1813_v57, %v881_v23 }
  0xc5   : > { %v931_v63 = vsel %vm925_vm4, %v918_v11, 0.0  ;;  %v786_v27 = vsel %vm775_vm1, %v773_v13, 0.0  ;;  %v836_v32 = vsel %vm825_vm2, %v823_v56, 0.0  ;;  %v873_v35 = vrot.slane %v741_v6, 1 }
  0xc6   : > { %v806_v30 = vadd.f32 %v794_v20, %v756_v7  ;;  %v799_v31 = vmul.f32 %v1807_v54, %v786_v27  ;;  %v967_v36 = vmul.f32 %v1818_v59, %v953_v25  ;;  %v975_v37 = vmul.f32 %v1820_v0, %v953_v25 }
  0xc7   : > { %v991_v38 = vmul.f32 %v1822_v4, %v953_v25  ;;  %v849_v39 = vmul.f32 %v1810_v55, %v836_v32  ;;  %v886_v43 = vsel %vm875_vm3, %v873_v35, 0.0  ;;  %v923_v44 = vrot.slane %v741_v6, 2  ;;  %v744_v32 = vpop.f32.mrf.mxu3 }
  0xc8   : > { %v856_v40 = vadd.f32 %v844_v22, %v806_v30  ;;  %v811_v42 = vadd.f32 %v799_v31, %v761_v24  ;;  %v983_v45 = vadd.f32 %v975_v37, %v1925_v5  ;;  %v984_v46 = vadd.f32 %v976_v48, %v967_v36 }
  0xc9   : > { %v999_v47 = vadd.f32 %v991_v38, %v1932_v15  ;;  %v899_v52 = vmul.f32 %v1813_v57, %v886_v43  ;;  %v944_v3 = vmul.f32 %v1816_v58, %v931_v63  ;;  %v936_v8 = vsel %vm925_vm4, %v923_v44, 0.0 }
  0xca   : > { %v906_v2 = vadd.f32 %v894_v26, %v856_v40  ;;  %v861_v7 = vadd.f32 %v849_v39, %v811_v42  ;;  %v1000_v11 = vadd.f32 %v992_v49, %v983_v45  ;;  %v2015_v13 = vadd.f32 %v993_v60, %v984_v46 }
  0xcb   : > { %v949_v6 = vmul.f32 %v1816_v58, %v936_v8  ;;  %v759_v5 = vmul.f32 %v1804_v53, %v735_v62  ;;  %v771_v14 = vrot.slane %v735_v62, 6  ;;  %v821_v17 = vrot.slane %v735_v62, 7 }
  0xcc   : > { %v2019_v48 = vadd.f32 %v944_v3, %v906_v2  ;;  %v911_v15 = vadd.f32 %v899_v52, %v861_v7  ;;  %v1016_v18 = vadd.f32 %v1008_v61, %v999_v47  ;;  %v2021_v56 = vadd.f32 %v1009_v1, %v1000_v11 }
  0xcd   : > { %v871_v20 = vrot.slane %v735_v62, 1  ;;  %v921_v22 = vrot.slane %v735_v62, 2  ;;  %v971_v24 = vmul.f32 %v1818_v59, %v1889_v19  ;;  %v784_v61 = vsel %vm775_vm1, %v771_v14, 0.0 }
  0xce   : > { %v970_v23 = vmul.f32 %v1818_v59, %v2019_v48  ;;  %v978_v49 = vmul.f32 %v1820_v0, %v2019_v48  ;;  %v994_v60 = vmul.f32 %v1822_v4, %v2019_v48  ;;  %v2031_v25 = vadd.f32 %v949_v6, %v911_v15 }
  0xcf   : > { %v834_v1 = vsel %vm825_vm2, %v821_v17, 0.0  ;;  %v884_v26 = vsel %vm875_vm3, %v871_v20, 0.0  ;;  %v1010_v63 = vmul.f32 %v1834_v12, %v2019_v48  ;;  %v797_v27 = vmul.f32 %v1807_v54, %v784_v61 }
  0xd0   : > { %v847_v30 = vmul.f32 %v1810_v55, %v834_v1  ;;  %v934_v31 = vsel %vm925_vm4, %v921_v22, 0.0  ;;  %v1015_v35 = vmul.f32 %v1834_v12, %v2031_v25  ;;  %v897_v36 = vmul.f32 %v1813_v57, %v884_v26 }
  0xd1   : > { %v947_v37 = vmul.f32 %v1816_v58, %v934_v31  ;;  %v980_v38 = vmul.f32 %v1820_v0, %v1976_v51  ;;  %v809_v39 = vadd.f32 %v797_v27, %v759_v5  ;;  %v987_v40 = vadd.f32 %v1898_v28, %v970_v23 }
  0xd2   : > { %v996_v42 = vmul.f32 %v1822_v4, %v1976_v51  ;;  %v762_v43 = vmul.f32 %v1804_v53, %v744_v32  ;;  %v774_v45 = vrot.slane %v744_v32, 6  ;;  %v824_v46 = vrot.slane %v744_v32, 7 }
  0xd3   : > { %v988_v44 = vadd.f32 %v980_v38, %v971_v24  ;;  %v874_v47 = vrot.slane %v744_v32, 1  ;;  %v859_v52 = vadd.f32 %v847_v30, %v809_v39  ;;  %v924_v2 = vrot.slane %v744_v32, 2 }
  0xd4   : > { %v1004_v62 = vadd.f32 %v996_v42, %v987_v40  ;;  %v972_v3 = vmul.f32 %v1818_v59, %v1976_v51  ;;  %v787_v7 = vsel %vm775_vm1, %v774_v45, 0.0  ;;  %v837_v28 = vsel %vm825_vm2, %v824_v46, 0.0 }
  0xd5   : > { %v887_v8 = vsel %vm875_vm3, %v874_v47, 0.0  ;;  %v985_v53 = vadd.f32 %v1949_v29, %v1883_v9  ;;  %v909_v11 = vadd.f32 %v897_v36, %v859_v52  ;;  %v800_v6 = vmul.f32 %v1807_v54, %v787_v7 }
  0xd6   : > { %v850_v5 = vmul.f32 %v1810_v55, %v837_v28  ;;  %v900_v15 = vmul.f32 %v1813_v57, %v887_v8  ;;  %v937_v59 = vsel %vm925_vm4, %v924_v2, 0.0  ;;  %v1011_v17 = vmul.f32 %v1834_v12, %v1889_v19 }
  0xd7   : > { %v1002_v14 = vadd.f32 %v994_v60, %v985_v53  ;;  %v1028_v20 = vmul.f32 %v1841_v16, %v1976_v51  ;;  %v959_v22 = vadd.f32 %v947_v37, %v909_v11  ;;  %v812_v23 = vadd.f32 %v800_v6, %v762_v43 }
  0xd8   : > { %v950_v9 = vmul.f32 %v1816_v58, %v937_v59  ;;  %v1025_v54 = vmul.f32 %v1841_v16, %v1929_v10  ;;  %v986_v57 = vadd.f32 %v978_v49, %v1936_v21  ;;  %v995_v50 = vmul.f32 %v1822_v4, %v1889_v19 }
  0xd9   : > { %v1019_v55 = vadd.f32 %v1011_v17, %v1002_v14  ;;  %v1012_v29 = vmul.f32 %v1834_v12, %v1976_v51  ;;  %v981_v60 = vmul.f32 %v1820_v0, %v959_v22  ;;  %v997_v24 = vmul.f32 %v1822_v4, %v959_v22 }
  0xda   : > { %v1013_v61 = vmul.f32 %v1834_v12, %v959_v22  ;;  %v1029_v58 = vmul.f32 %v1841_v16, %v959_v22  ;;  %v862_v1 = vadd.f32 %v850_v5, %v812_v23  ;;  %v1033_v10 = vadd.f32 %v1025_v54, %v1016_v18 }
  0xdb   : > { %v1036_v26 = vadd.f32 %v1028_v20, %v1019_v55  ;;  %v1003_v27 = vadd.f32 %v995_v50, %v986_v57  ;;  %v1005_v30 = vadd.f32 %v997_v24, %v988_v44  ;;  %v989_v49 = vadd.f32 %v981_v60, %v972_v3 }
  0xdc   : > { %v1021_v21 = vadd.f32 %v1013_v61, %v1004_v62  ;;  %v1026_v31 = vmul.f32 %v1841_v16, %v2019_v48  ;;  %v912_v32 = vadd.f32 %v900_v15, %v862_v1  ;;  %v1439_v36 = vmul.f32 -1.442695, %v1033_v10 }
  0xdd   : > { %v1442_v51 = vmul.f32 -1.442695, %v1036_v26  ;;  %v1020_v0 = vadd.f32 %v1012_v29, %v1003_v27  ;;  %v1006_v4 = vadd.f32 %v1954_v33, %v989_v49  ;;  %v1018_v37 = vadd.f32 %v1010_v63, %v2015_v13 }
  0xde   : > { %v1034_v12 = vadd.f32 %v1026_v31, %v2021_v56  ;;  %v1027_v18 = vmul.f32 %v1841_v16, %v1889_v19  ;;  %v962_v38 = vadd.f32 %v950_v9, %v912_v32  ;;  %v1038_v40 = vadd.f32 %v1966_v41, %v1021_v21 }
  0xdf   : > { %1522 = vpow2.f32 %v1442_v51  ;;  %v1037_v39 = vadd.f32 %v1029_v58, %v1020_v0  ;;  %v1023_v42 = vadd.f32 %v1015_v35, %v1006_v4  ;;  %v1031_v44 = vmul.f32 %v1841_v16, %v2031_v25 }
  0xe0   : > { %1524 = vpow2.f32 %v1439_v36  ;;  %v1440_v48 = vmul.f32 -1.442695, %v1034_v12  ;;  %v1035_v43 = vadd.f32 %v1027_v18, %v1018_v37  ;;  %v1032_v33 = vmul.f32 %v1841_v16, %v962_v38 }
  0xe1   : > { %v1443_v56 = vmul.f32 -1.442695, %v1037_v39  ;;  %v1022_v13 = vadd.f32 %v1957_v34, %v1005_v30  ;;  %v1444_v45 = vmul.f32 -1.442695, %v1038_v40 }
  0xe2   : > { %1526 = vpow2.f32 %v1440_v48  ;;  %v1441_v63 = vmul.f32 -1.442695, %v1035_v43  ;;  %v1040_v19 = vadd.f32 %v1032_v33, %v1023_v42 }
  0xe3   : > { %1528 = vpow2.f32 %v1443_v56  ;;  %v1039_v46 = vadd.f32 %v1031_v44, %v1022_v13 }
  0xe4   : > { %1530 = vpow2.f32 %v1441_v63  ;;  %v1446_v47 = vmul.f32 -1.442695, %v1040_v19 }
  0xe5   : > { %v1523_v41 = vpop.eup %1522  ;;  %1532 = vpow2.f32 %v1444_v45  ;;  %v1445_v25 = vmul.f32 -1.442695, %v1039_v46 }
  0xe6   : > { %v1525_v35 = vpop.eup %1524  ;;  %v1068_v52 = vadd.f32 1.0, %v1523_v41 }
  0xe7   : > { %v2098_v62 = vadd.f32 1.0, %v1525_v35 }
  0xe8   : > { %v1527_v2 = vpop.eup %1526  ;;  %1534 = vrcp.f32 %v1068_v52  ;;  %v1127_v28 = vand.u32 2147483647, %v1068_v52  ;;  %v1129_v53 = vand.u32 2147483648, %v1068_v52  ;;  %vm1123_vm5 = vweird.f32 %v1068_v52 }
  0xe9   : > { %v1529_v16 = vpop.eup %1528  ;;  %1536 = vrcp.f32 %v2098_v62  ;;  %v2103_v7 = vadd.f32 1.0, %v1527_v2  ;;  %v1082_v11 = vand.u32 2147483647, %v2098_v62  ;;  %v1084_v6 = vand.u32 2147483648, %v2098_v62 }
  0xea   : > { %v1531_v34 = vpop.eup %1530  ;;  %1538 = vpow2.f32 %v1446_v47  ;;  %v2101_v3 = vadd.f32 1.0, %v1529_v16  ;;  %vm2112_vm6 = vcmp.eq.f32.partialorder %v1127_v28, 8.507059e+37  ;;  %vm1078_vm7 = vweird.f32 %v2098_v62 }
  0xeb   : > { %v2105_v8 = vadd.f32 1.0, %v1531_v34  ;;  %1540 = vpow2.f32 %v1445_v25  ;;  %v1533_v5 = vpop.eup %1532  ;;  %v1130_v22 = vor.u32 1.1754944e-38, %v1129_v53  ;;  %vm2118_vm8 = vcmp.eq.f32.partialorder %v1082_v11, 8.507059e+37 }
  0xec   : > { %1542 = vrcp.f32 %v2101_v3  ;;  %v1085_v54 = vor.u32 1.1754944e-38, %v1084_v6  ;;  %vm1138_vm9 = vweird.f32 %v2101_v3  ;;  %v1142_v50 = vand.u32 2147483647, %v2101_v3 }
  0xed   : > { %1544 = vrcp.f32 %v2103_v7  ;;  %v2124_v29 = vadd.f32 1.0, %v1533_v5  ;;  %v1144_v61 = vand.u32 2147483648, %v2101_v3  ;;  %v1097_v58 = vand.u32 2147483647, %v2103_v7 }
  0xee   : > { %v1535_v15 = vpop.eup %1534  ;;  %1546 = vrcp.f32 %v2105_v8  ;;  %v1099_v31 = vand.u32 2147483648, %v2103_v7  ;;  %vm2137_vm12 = vcmp.eq.f32.partialorder %v1142_v50, 8.507059e+37  ;;  %v1114_v37 = vand.u32 2147483648, %v2105_v8 }
  0xef   : > { %v1537_v59 = vpop.eup %1536  ;;  %v1119_v14 = vmul.f32 %v1535_v15, %v1068_v52  ;;  %vm1124_vm10 = vweird.f32 %v1535_v15  ;;  %1548 = vrcp.f32 %v2124_v29  ;;  %v1145_v63 = vor.u32 1.1754944e-38, %v1144_v61 }
  0xf0   : > { %v1539_v20 = vpop.eup %1538  ;;  %v1074_v23 = vmul.f32 %v1537_v59, %v2098_v62  ;;  %vm1079_vm11 = vweird.f32 %v1537_v59  ;;  %vm1125_vm13 = vmor %vm1123_vm5, %vm1124_vm10  ;;  %vm1108_vm4 = vweird.f32 %v2105_v8  ;;  %v1112_v35 = vand.u32 2147483647, %v2105_v8 }
  0xf1   : > { %v1541_v55 = vpop.eup %1540  ;;  %v1120_v57 = vsub.f32 1.0, %v1119_v14  ;;  %vm1080_vm15 = vmor %vm1078_vm7, %vm1079_vm11  ;;  %v2153_v43 = vadd.f32 1.0, %v1539_v20  ;;  %vm1093_vm5 = vweird.f32 %v2103_v7  ;;  %v1115_v34 = vor.u32 1.1754944e-38, %v1114_v37 }
  0xf2   : > { %v1543_v60 = vpop.eup %1542  ;;  %v1075_v24 = vsub.f32 1.0, %v1074_v23  ;;  %v2132_v27 = vadd.f32 1.0, %v1541_v55  ;;  %v1100_v53 = vor.u32 1.1754944e-38, %v1099_v31  ;;  %vm1113_vm10 = vcmp.eq.f32.partialorder %v1112_v35, 8.507059e+37 }
  0xf3   : > { %v2128_v1 = vpop.eup %1544  ;;  %v1121_v26 = vmul.f32 %v1535_v15, %v1120_v57  ;;  %v1134_v10 = vmul.f32 %v1543_v60, %v2101_v3  ;;  %vm1139_vm14 = vweird.f32 %v1543_v60  ;;  %v1159_v3 = vand.u32 2147483648, %v2124_v29 }
  0xf4   : > { %v1547_v30 = vpop.eup %1546  ;;  %v1076_v21 = vmul.f32 %v1537_v59, %v1075_v24  ;;  %v1089_v49 = vmul.f32 %v2128_v1, %v2103_v7  ;;  %1550 = vrcp.f32 %v2132_v27  ;;  %vm1140_vm2 = vmor %vm1138_vm9, %vm1139_vm14  ;;  %vm1094_vm3 = vweird.f32 %v2128_v1 }
  0xf5   : > { %v1122_v32 = vadd.f32 %v1535_v15, %v1121_v26  ;;  %v1135_v51 = vsub.f32 1.0, %v1134_v10  ;;  %v1104_v0 = vmul.f32 %v1547_v30, %v2105_v8  ;;  %v1549_v44 = vpop.eup %1548  ;;  %vm1109_vm1 = vweird.f32 %v1547_v30  ;;  %vm2183_vm7 = vmor %vm1093_vm5, %vm1094_vm3 }
  0xf6   : > { %v1077_v4 = vadd.f32 %v1537_v59, %v1076_v21  ;;  %v1090_v12 = vsub.f32 1.0, %v1089_v49  ;;  %v1149_v45 = vmul.f32 %v1549_v44, %v2124_v29  ;;  %1552 = vrcp.f32 %v2153_v43 }
  0xf7   : > { %v1126_v18 = vsel %vm1125_vm13, %v1535_v15, %v1122_v32  ;;  %v1136_v38 = vmul.f32 %v1543_v60, %v1135_v51  ;;  %v1105_v39 = vsub.f32 1.0, %v1104_v0  ;;  %vm1098_vm9 = vcmp.eq.f32.partialorder %v1097_v58, 8.507059e+37 }
  0xf8   : > { %v2150_v40 = vsel %vm2112_vm6, %v1130_v22, %v1126_v18  ;;  %v1081_v42 = vsel %vm1080_vm15, %v1537_v59, %v1077_v4  ;;  %v1091_v48 = vmul.f32 %v2128_v1, %v1090_v12  ;;  %vm2176_vm6 = vmor %vm1108_vm4, %vm1109_vm1  ;;  %v1150_v62 = vsub.f32 1.0, %v1149_v45 }
  0xf9   : > { %1207 = vrot.lane.b32.xlu1 %v2150_v40, %s1634_s19  ;;  %v2159_v33 = vsel %vm2118_vm8, %v1085_v54, %v1081_v42  ;;  %v1137_v56 = vadd.f32 %v1543_v60, %v1136_v38  ;;  %v1106_v13 = vmul.f32 %v1547_v30, %v1105_v39  ;;  %vm1154_vm8 = vweird.f32 %v1549_v44 }
  0xfa   : > { %1201 = vrot.lane.b32.xlu0 %v2159_v33, %s1634_s19  ;;  %v1092_v19 = vadd.f32 %v2128_v1, %v1091_v48  ;;  %v1551_v25 = vpop.eup %1550  ;;  %v1151_v28 = vmul.f32 %v1549_v44, %v1150_v62  ;;  %v1157_v11 = vand.u32 2147483647, %v2124_v29  ;;  %vm1153_vm11 = vweird.f32 %v2124_v29 }
  0xfb   : > { %v1141_v46 = vsel %vm1140_vm2, %v1543_v60, %v1137_v56  ;;  %v1107_v41 = vadd.f32 %v1547_v30, %v1106_v13  ;;  %v1164_v8 = vmul.f32 %v1551_v25, %v2132_v27  ;;  %v1160_v20 = vor.u32 1.1754944e-38, %v1159_v3 }
  0xfc   : > { %v2173_v47 = vsel %vm2137_vm12, %v1145_v63, %v1141_v46  ;;  %v1096_v7 = vsel %vm2183_vm7, %v2128_v1, %v1092_v19  ;;  %v1152_v5 = vadd.f32 %v1549_v44, %v1151_v28  ;;  %vm1155_vm12 = vmor %vm1153_vm11, %vm1154_vm8  ;;  %v1553_v14 = vpop.eup %1552  ;;  %vm1169_vm13 = vweird.f32 %v1551_v25 }
  0xfd   : > { %1209 = vrot.lane.b32.xlu2 %v2173_v47, %s1634_s19  ;;  %v1111_v16 = vsel %vm2176_vm6, %v1547_v30, %v1107_v41  ;;  %v1165_v15 = vsub.f32 1.0, %v1164_v8  ;;  %v1101_v59 = vsel %vm1098_vm9, %v1100_v53, %v1096_v7  ;;  %vm1158_vm14 = vcmp.eq.f32.partialorder %v1157_v11, 8.507059e+37 }
  0xfe   : > { %v1116_v6 = vsel %vm1113_vm10, %v1115_v34, %v1111_v16  ;;  %v1156_v17 = vsel %vm1155_vm12, %v1549_v44, %v1152_v5  ;;  %v1174_v23 = vand.u32 2147483648, %v2132_v27  ;;  %v1179_v9 = vmul.f32 %v1553_v14, %v2153_v43 }
  0xff   : > { %v1166_v22 = vmul.f32 %v1551_v25, %v1165_v15  ;;  %v1161_v54 = vsel %vm1158_vm14, %v1160_v20, %v1156_v17  ;;  %vm1168_vm15 = vweird.f32 %v2132_v27  ;;  %v1172_v57 = vand.u32 2147483647, %v2132_v27 }
 0x100   : > { %vm1170_vm1 = vmor %vm1168_vm15, %vm1169_vm13  ;;  %v1180_v50 = vsub.f32 1.0, %v1179_v9  ;;  %v1189_v60 = vand.u32 2147483648, %v2153_v43  ;;  %v1175_v24 = vor.u32 1.1754944e-38, %v1174_v23  ;;  %vm1184_vm2 = vweird.f32 %v1553_v14 }
 0x101   : > { %1205 = vrot.lane.b32.xlu1 %v1116_v6, %s1634_s19  ;;  %v1167_v55 = vadd.f32 %v1551_v25, %v1166_v22  ;;  %v1187_v58 = vand.u32 2147483647, %v2153_v43  ;;  %vm1173_vm3 = vcmp.eq.f32.partialorder %v1172_v57, 8.507059e+37  ;;  %vm1183_vm4 = vweird.f32 %v2153_v43 }
 0x102   : > { %1203 = vrot.lane.b32.xlu0 %v1101_v59, %s1634_s19  ;;  %v1181_v61 = vmul.f32 %v1553_v14, %v1180_v50  ;;  %vm1185_vm5 = vmor %vm1183_vm4, %vm1184_vm2  ;;  %v1190_v10 = vor.u32 1.1754944e-38, %v1189_v60  ;;  %vm1233_vm7 = vcmask 130048  }
 0x103   : > { %v1171_v29 = vsel %vm1170_vm1, %v1551_v25, %v1167_v55  ;;  %vm1188_vm6 = vcmp.eq.f32.partialorder %v1187_v58, 8.507059e+37 }
 0x104   : > { %v1176_v1 = vsel %vm1173_vm3, %v1175_v24, %v1171_v29  ;;  %v1182_v26 = vadd.f32 %v1553_v14, %v1181_v61 }
 0x105   : > { %1211 = vrot.lane.b32.xlu2 %v1161_v54, %s1634_s19 }
 0x106   : > { %v1186_v27 = vsel %vm1185_vm5, %v1553_v14, %v1182_v26 }
 0x107   : > { %v1191_v30 = vsel %vm1188_vm6, %v1190_v10, %v1186_v27 }
 0x109   : > { %1215 = vrot.lane.b32.xlu1 %v1191_v30, %s1634_s19 }
 0x10a   : > { %1213 = vrot.lane.b32.xlu0 %v1176_v1, %s1634_s19 }
 0x157   : > { %v1210_v21 = vpop.permute.xlu2 %1209 }
 0x158   : > { %v1229_v49 = vsel %vm657_vm0, %v2173_v47, %v1210_v21 }
 0x159   : > { %1238 = vst.msk [vmem:[%s512_s23 + $0x20] sm:$0xff] %vm1233_vm7, %v1229_v49 }
 0x15f   : > { %v1212_v31 = vpop.permute.xlu2 %1211 }
 0x160   : > { %v1230_v32 = vsel %vm657_vm0, %v1161_v54, %v1212_v31 }
 0x161   : > { %1239 = vst.msk [vmem:[%s512_s23 + $0x28] sm:$0xff] %vm1233_vm7, %v1230_v32 }
 0x16b   : > { %v1208_v51 = vpop.permute.xlu1 %1207 }
 0x16c   : > { %v1228_v36 = vsel %vm657_vm0, %v2150_v40, %v1208_v51  ;;  %v1202_v0 = vpop.permute.xlu0 %1201 }
 0x16d   : > { %1237 = vst.msk [vmem:[%s512_s23 + $0x18] sm:$0xff] %vm1233_vm7, %v1228_v36  ;;  %v1225_v4 = vsel %vm657_vm0, %v2159_v33, %v1202_v0 }
 0x16e   : > { %1234 = vst.msk [vmem:[%s512_s23] sm:$0xff] %vm1233_vm7, %v1225_v4 }
 0x173   : > { %v1206_v12 = vpop.permute.xlu1 %1205 }
 0x174   : > { %v1204_v37 = vpop.permute.xlu0 %1203  ;;  %v1227_v18 = vsel %vm657_vm0, %v1116_v6, %v1206_v12 }
 0x175   : > { %v1226_v38 = vsel %vm657_vm0, %v1101_v59, %v1204_v37  ;;  %1236 = vst.msk [vmem:[%s512_s23 + $0x10] sm:$0xff] %vm1233_vm7, %v1227_v18 }
 0x176   : > { %1235 = vst.msk [vmem:[%s512_s23 + $0x8] sm:$0xff] %vm1233_vm7, %v1226_v38 }
 0x17b   : > { %v1216_v42 = vpop.permute.xlu1 %1215 }
 0x17c   : > { %v1214_v39 = vpop.permute.xlu0 %1213  ;;  %v1232_v48 = vsel %vm657_vm0, %v1191_v30, %v1216_v42 }
 0x17d   : > { %v1231_v40 = vsel %vm657_vm0, %v1176_v1, %v1214_v39  ;;  %1241 = vst.msk [vmem:[%s512_s23 + $0x38] sm:$0xff] %vm1233_vm7, %v1232_v48 }
 0x17e   : > { %1240 = vst.msk [vmem:[%s512_s23 + $0x30] sm:$0xff] %vm1233_vm7, %v1231_v40 }
 0x17f   : > { %1581 = shalt.err (!%p1578_p5)
}
 0x180   : > { %s1635_s20 = smov 128  }
 0x181   : > { %1465 = dma.vmem_to_hbm [thread:$0]  (%p1721_p4), %s1258_s22, 1024, %s1260_s25, %s1243_s30, %s1635_s20, %s1635_s20, %s1634_s19  }
 0x182 PF: > { %p1471_p6 = scmp.ge.s32.totalorder %s1632_s10, 2  ;;  %s1274_s23 = sand.u32 1, %s1612_s27  }
 0x183   : > { %s1275_s21 = scalar_lea.sflag [#allocation3], %s1274_s23 }
 0x184   : > { %p1468_p7 = pnand %p1471_p6, %p1728_p8 }
 0x186   : > { %p1469_p9 = pneg %p1468_p7 }
 0x188   : > { %1607 = dma.done.wait (%p1469_p9), %s1275_s21, 1024  }
 0x189   : > { %1609 = vsyncadd (%p1469_p9), %s1275_s21, 4294966272  ;;  %s21_s10 = sadd.s32 1, %s1632_s10   ;;  %s2290_s27 = smov %s1616_s28 }
 0x18a   : > { %p18_p10 = scmp.ge.s32.totalorder %s21_s10, 6   ;;  %s2291_s28 = smov %s1620_s29 }
 0x18b   : > { %s2292_s29 = smov %s1734_s18  ;;  %s2293_s30 = smov %s1628_s9 }
 0x18c   : > { %s2294_s9 = smov %s2296_s13  ;;  %20 = sbr.rel (!%p18_p10) target bundleno = 4 (0x4), region = 99 }
 0x191   :  { %1281 = vsyncpa [#allocation3], 1 }
 0x192   :  { %1283 = vsyncpa [#allocation3 + $0x1], 1 }

</bundles_post_ra>
